<compile_context>
chip_gen: v5e
topology: v5e:2x2
jax: 0.10.0
libtpu: 0.0.40
codegen_flags: <defaults>
</compile_context>

<pallas_src>
import functools
import math

import jax
import jax.numpy as jnp
from jax.experimental import pallas as pl
from jax.experimental.pallas import tpu as pltpu

# ----------------------------- small, module-consistent config ------------------------------
VOCAB      = 64
HIDDEN     = 32
N_LAYERS   = 2
N_HEADS    = 4
HEAD_DIM   = HIDDEN // N_HEADS
N_EXPERTS  = 4
TOP_K      = 2
FFN        = 64
EPS        = 1e-5
ROPE_THETA = 10000.0
MIN_F32    = float(jnp.finfo(jnp.float32).min)


# ------------------------------------- Pallas kernels ---------------------------------------
def _attn_block_kernel(x_ref, rot_ref, ln1_ref, ln2_ref, wqkv_ref, wo_ref, gate_ref,
                       hh_ref, gl_ref, attn_scr,
                       *, eps, batch, seq, n_heads, head_dim, scale):
    """Fused per-layer attention block, one grid step for the whole [B*S, D] token slab.

    RMSNorm -> fused QKV (one wide matmul) -> RoPE on full q/k slabs (rotate-half via a
    constant ±1 permutation matmul) -> per-(batch, head) causal attention accumulated
    directly into the Wo projection -> residual add -> post-attention RMSNorm -> f32
    router gate logits.  Outputs: [N, 2D] slab = [h_new | h_norm2], and [N, E] gate logits.
    """
    x = x_ref[...]                                                     # [N, D] f32 residual
    n_tok, d = x.shape

    # ---- pre-attention RMSNorm (f32 stats) ----
    var = jnp.mean(x * x, axis=-1, keepdims=True)
    xn = x * jax.lax.rsqrt(var + eps) * ln1_ref[...]                   # [N, D]

    # ---- fused QKV projection for all tokens at once (bf16 MXU, f32 accumulate) ----
    qkv = jnp.dot(xn.astype(jnp.bfloat16), wqkv_ref[...],
                  preferred_element_type=jnp.float32)                  # [N, 3D]
    q = qkv[:, :d]
    k = qkv[:, d:2 * d]
    v = qkv[:, 2 * d:]

    # ---- RoPE on the full [N, D] q/k slabs (heads share the cos/sin table) ----
    half = head_dim // 2
    row = jax.lax.broadcasted_iota(jnp.int32, (n_tok, d), 0)
    pos = (row % seq).astype(jnp.float32)                              # position within sequence
    lane = jax.lax.broadcasted_iota(jnp.int32, (n_tok, d), 1)
    j = lane % head_dim
    jj = jnp.where(j < half, j, j - half).astype(jnp.float32)
    inv_freq = jnp.exp(jj * (-2.0 * math.log(ROPE_THETA) / head_dim))  # theta^(-2i/Dh)
    ang = pos * inv_freq
    cos = jnp.cos(ang)
    sin = jnp.sin(ang)
    # rotate_half(x) == x @ R with R a constant block-diagonal ±1 permutation (MXU, no
    # lane concatenates / relayouts).
    rot = rot_ref[...]                                                 # [D, D] f32
    q = q * cos + jnp.dot(q, rot, preferred_element_type=jnp.float32) * sin
    k = k * cos + jnp.dot(k, rot, preferred_element_type=jnp.float32) * sin

    # ---- in-kernel causal mask [S, S] ----
    rr = jax.lax.broadcasted_iota(jnp.int32, (seq, seq), 0)
    cc = jax.lax.broadcasted_iota(jnp.int32, (seq, seq), 1)
    causal = cc <= rr

    # ---- per-(batch, head) attention; head outputs accumulated straight into Wo ----
    # TODO(synk): at production sizes batch the heads onto the sublane axis and issue one
    #             wide dot_general per stage; these per-head 8-wide matmuls use <7% of the MXU.
    for b in range(batch):
        r0 = b * seq
        acc = None
        for h in range(n_heads):
            lo = h * head_dim
            hi = lo + head_dim
            qh = q[r0:r0 + seq, lo:hi]
            kh = k[r0:r0 + seq, lo:hi]
            vh = v[r0:r0 + seq, lo:hi]
            # contract on Dh of both operands (no explicit K transpose)
            sc = jax.lax.dot_general(qh, kh, (((1,), (1,)), ((), ())),
                                     preferred_element_type=jnp.float32) * scale
            sc = jnp.where(causal, sc, MIN_F32)
            m = jnp.max(sc, axis=-1, keepdims=True)
            p = jnp.exp(sc - m)
            p = p / jnp.sum(p, axis=-1, keepdims=True)                 # exact normalization (f32)
            pv = jnp.dot(p.astype(jnp.bfloat16), vh.astype(jnp.bfloat16),
                         preferred_element_type=jnp.float32)           # [S, Dh]
            po = jnp.dot(pv.astype(jnp.bfloat16), wo_ref[lo:hi, :],
                         preferred_element_type=jnp.float32)           # [S, D]
            acc = po if acc is None else acc + po
        attn_scr[r0:r0 + seq, :] = acc                                 # static sublane slice

    # ---- residual add + post-attention RMSNorm + f32 router gate ----
    h_new = x + attn_scr[...]
    hh_ref[:, :d] = h_new
    var2 = jnp.mean(h_new * h_new, axis=-1, keepdims=True)
    hn2 = h_new * jax.lax.rsqrt(var2 + eps) * ln2_ref[...]
    hh_ref[:, d:] = hn2
    # router kept in f32: bf16 rounding can flip top-k expert selection on near-ties
    gl_ref[...] = jnp.dot(hn2, gate_ref[...], preferred_element_type=jnp.float32)


def attention_block(hidden2d, rope_r, ln1, ln2, wqkv, wo, gate, *, batch, seq):
    n, d = hidden2d.shape
    e = gate.shape[1]
    kern = functools.partial(_attn_block_kernel, eps=EPS, batch=batch, seq=seq,
                             n_heads=N_HEADS, head_dim=HEAD_DIM,
                             scale=1.0 / math.sqrt(HEAD_DIM))
    return pl.pallas_call(
        kern,
        out_shape=(jax.ShapeDtypeStruct((n, 2 * d), jnp.float32),      # [h_new | h_norm2]
                   jax.ShapeDtypeStruct((n, e), jnp.float32)),
        grid=(1,),                                                     # single step: whole token slab
        in_specs=[pl.BlockSpec((n, d), lambda i: (0, 0)),
                  pl.BlockSpec((d, d), lambda i: (0, 0)),
                  pl.BlockSpec((1, d), lambda i: (0, 0)),
                  pl.BlockSpec((1, d), lambda i: (0, 0)),
                  pl.BlockSpec((d, 3 * d), lambda i: (0, 0)),
                  pl.BlockSpec((d, d), lambda i: (0, 0)),
                  pl.BlockSpec((d, e), lambda i: (0, 0))],
        out_specs=(pl.BlockSpec((n, 2 * d), lambda i: (0, 0)),
                   pl.BlockSpec((n, e), lambda i: (0, 0))),
        scratch_shapes=[pltpu.VMEM((n, d), jnp.float32)],
        compiler_params=pltpu.CompilerParams(dimension_semantics=("arbitrary",)),
    )(hidden2d, rope_r, ln1.reshape(1, d), ln2.reshape(1, d), wqkv, wo, gate)


def _moe_kernel(hn_ref, res_ref, w1_ref, w3_ref, w2_ref, rw_ref, o_ref):
    """Expert SwiGLU FFN, accumulated across the expert ('arbitrary', last) grid axis.

    Output block stays VMEM-resident across experts; residual add is fused as the init.
    Per-expert routing weight arrives as a pre-sliced [tok, 1] column (no in-kernel
    iota / cross-lane reduction).
    """
    e = pl.program_id(1)

    @pl.when(e == 0)
    def _():
        o_ref[...] = res_ref[...]                                      # residual fused into init

    x = hn_ref[...].astype(jnp.bfloat16)                               # [tok, D]
    h1 = jnp.dot(x, w1_ref[0], preferred_element_type=jnp.float32)     # [tok, F]
    h3 = jnp.dot(x, w3_ref[0], preferred_element_type=jnp.float32)     # [tok, F]
    act = (h1 * jax.nn.sigmoid(h1)) * h3                               # SiLU(w1 x) * (w3 x), f32
    out = jnp.dot(act.astype(jnp.bfloat16), w2_ref[0],
                  preferred_element_type=jnp.float32)                  # [tok, D]
    o_ref[...] = o_ref[...] + out * rw_ref[0]                          # [tok,1] broadcast over D


def moe_block(h_norm2d, residual2d, w1, w3, w2, rw_e):
    n, d = h_norm2d.shape
    e, _, f = w1.shape
    tok_tile = n   # single token tile at toy size; TODO(synk): sweep 256-1024 at production size
    nt = n // tok_tile
    return pl.pallas_call(
        _moe_kernel,
        out_shape=jax.ShapeDtypeStruct((n, d), jnp.float32),
        grid=(nt, e),
        in_specs=[pl.BlockSpec((tok_tile, d), lambda t, j: (t, 0)),
                  pl.BlockSpec((tok_tile, d), lambda t, j: (t, 0)),
                  pl.BlockSpec((1, d, f), lambda t, j: (j, 0, 0)),
                  pl.BlockSpec((1, d, f), lambda t, j: (j, 0, 0)),
                  pl.BlockSpec((1, f, d), lambda t, j: (j, 0, 0)),
                  pl.BlockSpec((1, tok_tile, 1), lambda t, j: (j, t, 0))],
        out_specs=pl.BlockSpec((tok_tile, d), lambda t, j: (t, 0)),
        compiler_params=pltpu.CompilerParams(dimension_semantics=("parallel", "arbitrary")),
    )(h_norm2d, residual2d, w1, w3, w2, rw_e)


def _lm_head_kernel(x_ref, lnf_ref, w_ref, b_ref, logits_ref, *, eps):
    """Fused final RMSNorm -> LM projection.  Logits only (softmax in wrapper)."""
    x = x_ref[...]                                                     # [N, D]
    var = jnp.mean(x * x, axis=-1, keepdims=True)
    xn = x * jax.lax.rsqrt(var + eps) * lnf_ref[...]
    logits_ref[...] = jnp.dot(xn.astype(jnp.bfloat16), w_ref[...],
                              preferred_element_type=jnp.float32) + b_ref[...]


def lm_head(x2d, lnf, w, b):
    n, d = x2d.shape
    v = w.shape[1]
    return pl.pallas_call(
        functools.partial(_lm_head_kernel, eps=EPS),
        out_shape=jax.ShapeDtypeStruct((n, v), jnp.float32),
        grid=(1,),
        in_specs=[pl.BlockSpec((n, d), lambda t: (0, 0)),
                  pl.BlockSpec((1, d), lambda t: (0, 0)),
                  pl.BlockSpec((d, v), lambda t: (0, 0)),
                  pl.BlockSpec((1, v), lambda t: (0, 0))],
        out_specs=pl.BlockSpec((n, v), lambda t: (0, 0)),
        compiler_params=pltpu.CompilerParams(dimension_semantics=("arbitrary",)),
    )(x2d, lnf.reshape(1, d), w, b.reshape(1, v))


# --------------------------------------- params & glue ---------------------------------------
def _rope_rotate_matrix(d, head_dim):
    """Constant block-diagonal ±1 matrix R with rotate_half(x) == x @ R (per head)."""
    half = head_dim // 2
    idx = jnp.arange(d)
    a = idx[:, None]          # source dim
    b = idx[None, :]          # target dim
    same_head = (a // head_dim) == (b // head_dim)
    r = jnp.where(same_head & (a == b + half), -1.0, 0.0) + \
        jnp.where(same_head & (a + half == b), 1.0, 0.0)
    return r.astype(jnp.float32)


def init_params(key):
    keys = jax.random.split(key, 3 + N_LAYERS)

    def nrm(k, shape, dtype=jnp.bfloat16):
        return (0.02 * jax.random.normal(k, shape)).astype(dtype)

    params = {
        'emb': nrm(keys[0], (VOCAB, HIDDEN), jnp.float32),
        'lm_w': nrm(keys[1], (HIDDEN, VOCAB)),                         # bf16 (MXU operand)
        'lm_b': jnp.zeros((VOCAB,), jnp.float32),
        'final_norm': jnp.ones((HIDDEN,), jnp.float32),
        'layers': [],
    }
    for li in range(N_LAYERS):
        lk = jax.random.split(keys[3 + li], 6)
        params['layers'].append({
            'ln1': jnp.ones((HIDDEN,), jnp.float32),
            'ln2': jnp.ones((HIDDEN,), jnp.float32),
            'wqkv': nrm(lk[0], (HIDDEN, 3 * N_HEADS * HEAD_DIM)),      # fused q/k/v, bf16
            'wo': nrm(lk[1], (N_HEADS * HEAD_DIM, HIDDEN)),            # bf16
            'gate': nrm(lk[2], (HIDDEN, N_EXPERTS), jnp.float32),      # router kept f32
            'w1': nrm(lk[3], (N_EXPERTS, HIDDEN, FFN)),                # bf16
            'w3': nrm(lk[4], (N_EXPERTS, HIDDEN, FFN)),                # bf16
            'w2': nrm(lk[5], (N_EXPERTS, FFN, HIDDEN)),                # bf16
        })
    return params


def mixtral_forward(params, input_ids):
    B, S = input_ids.shape
    D = HIDDEN
    N = B * S

    rope_r = _rope_rotate_matrix(D, HEAD_DIM)
    hidden = params['emb'][input_ids].reshape(N, D)                    # [N, D] gather (glue)

    all_hidden_states = ()
    all_router_logits = ()
    all_self_attns = ()
    for lp in params['layers']:
        # ---- fused attention block (norm + qkv + rope + attn + wo + residual + norm2 + gate) ----
        hh, router_logits = attention_block(
            hidden, rope_r, lp['ln1'], lp['ln2'], lp['wqkv'], lp['wo'], lp['gate'],
            batch=B, seq=S)
        h_new = hh[:, :D]
        h_norm2 = hh[:, D:]
        all_self_attns += (None,)   # TODO(synk): attention probs not materialized in fused kernel

        # ---- top-k routing (tiny E=4 selection kept in plain JAX) ----
        rp = jax.nn.softmax(router_logits, axis=-1)                    # [N, E] f32
        topv, topi = jax.lax.top_k(rp, TOP_K)
        topv = topv / jnp.sum(topv, axis=-1, keepdims=True)
        rw = jnp.sum(jax.nn.one_hot(topi, N_EXPERTS, dtype=jnp.float32) * topv[..., None], axis=1)
        rw_e = rw.T.reshape(N_EXPERTS, N, 1)                           # (E, N, 1) for BlockSpec slicing

        # ---- sparse-MoE FFN (residual add fused into accumulator init) ----
        hidden = moe_block(h_norm2, h_new, lp['w1'], lp['w3'], lp['w2'], rw_e)

        all_hidden_states += (hidden.reshape(B, S, D),)
        all_router_logits += (router_logits.reshape(B, S, N_EXPERTS),)

    # ---- fused final norm + lm head (logits only; softmax in wrapper, f32) ----
    logits = lm_head(hidden, params['final_norm'], params['lm_w'], params['lm_b'])
    probs = jax.nn.softmax(logits, axis=-1)

    return {
        'next_token_probability': probs.reshape(B, S, VOCAB),
        'last_hidden_state': logits.reshape(B, S, VOCAB),
        'next-kv-cache': None,                                         # TODO(synk): KV-cache not implemented
        'all_hidden_states': all_hidden_states,
        'all_self_attentions': all_self_attns,
        'all_router_logits': all_router_logits,
        'loss': 0,                                                     # TODO(synk): CE loss branch not implemented
    }


# ------------------------------------------ main ---------------------------------------------
if __name__ == "__main__":
    key = jax.random.PRNGKey(0)
    pkey, ikey = jax.random.split(key)
    params = init_params(pkey)

    B, S = 2, 8
    input_ids = jax.random.randint(ikey, (B, S), 0, VOCAB, dtype=jnp.int32)

    out = jax.jit(mixtral_forward)(params, input_ids)
    out = jax.block_until_ready(out)

    probs = out['next_token_probability']
    assert probs.shape == (B, S, VOCAB)
    assert out['last_hidden_state'].shape == (B, S, VOCAB)
    assert bool(jnp.allclose(jnp.sum(probs, axis=-1), 1.0, atol=1e-4))
    assert bool(jnp.all(jnp.isfinite(probs)))
    print("KERNEL_OK")
</pallas_src>

<mosaic_0001>
module attributes {stable_mosaic.version = 11 : i64} {
  func.func @_attn_block_kernel(%arg0: i32, %arg1: memref<16x32xf32, #tpu.memory_space<vmem>>, %arg2: memref<32x32xf32, #tpu.memory_space<vmem>>, %arg3: memref<1x32xf32, #tpu.memory_space<vmem>>, %arg4: memref<1x32xf32, #tpu.memory_space<vmem>>, %arg5: memref<32x96xbf16, #tpu.memory_space<vmem>>, %arg6: memref<32x32xbf16, #tpu.memory_space<vmem>>, %arg7: memref<32x4xf32, #tpu.memory_space<vmem>>, %arg8: memref<16x64xf32, #tpu.memory_space<vmem>>, %arg9: memref<16x4xf32, #tpu.memory_space<vmem>>, %arg10: memref<16x32xf32, #tpu.memory_space<vmem>>) attributes {dimension_semantics = [#tpu.dimension_semantics<arbitrary>], iteration_bounds = array<i64: 1>, scalar_prefetch = 0 : i64, scratch_operands = 1 : i64, tpu.core_type = #tpu.core_type<tc>, window_params = [{pipeline_mode = #tpu.pipeline_mode<synchronous>, transform_indices = @transform_0, window_bounds = array<i64: 16, 32>}, {pipeline_mode = #tpu.pipeline_mode<synchronous>, transform_indices = @transform_1, window_bounds = array<i64: 32, 32>}, {pipeline_mode = #tpu.pipeline_mode<synchronous>, transform_indices = @transform_2, window_bounds = array<i64: 1, 32>}, {pipeline_mode = #tpu.pipeline_mode<synchronous>, transform_indices = @transform_3, window_bounds = array<i64: 1, 32>}, {pipeline_mode = #tpu.pipeline_mode<synchronous>, transform_indices = @transform_4, window_bounds = array<i64: 32, 96>}, {pipeline_mode = #tpu.pipeline_mode<synchronous>, transform_indices = @transform_5, window_bounds = array<i64: 32, 32>}, {pipeline_mode = #tpu.pipeline_mode<synchronous>, transform_indices = @transform_6, window_bounds = array<i64: 32, 4>}, {pipeline_mode = #tpu.pipeline_mode<synchronous>, transform_indices = @transform_7, window_bounds = array<i64: 16, 64>}, {pipeline_mode = #tpu.pipeline_mode<synchronous>, transform_indices = @transform_8, window_bounds = array<i64: 16, 4>}]} {
    %c0 = arith.constant 0 : index
    %c0_0 = arith.constant 0 : index
    %0 = vector.load %arg1[%c0, %c0_0] : memref<16x32xf32, #tpu.memory_space<vmem>>, vector<16x32xf32>
    %1 = arith.mulf %0, %0 : vector<16x32xf32>
    %cst = arith.constant dense<0.000000e+00> : vector<16xf32>
    %2 = vector.multi_reduction <add>, %1, %cst [1] : vector<16x32xf32> to vector<16xf32>
    %3 = vector.shape_cast %2 : vector<16xf32> to vector<16x1xf32>
    %cst_1 = arith.constant 3.200000e+01 : f32
    %4 = vector.broadcast %cst_1 : f32 to vector<16x1xf32>
    %5 = arith.divf %3, %4 : vector<16x1xf32>
    %cst_2 = arith.constant 9.99999974E-6 : f32
    %6 = vector.broadcast %cst_2 : f32 to vector<16x1xf32>
    %7 = arith.addf %5, %6 : vector<16x1xf32>
    %8 = math.rsqrt %7 : vector<16x1xf32>
    %9 = vector.broadcast %8 : vector<16x1xf32> to vector<16x32xf32>
    %10 = arith.mulf %0, %9 : vector<16x32xf32>
    %c0_3 = arith.constant 0 : index
    %c0_4 = arith.constant 0 : index
    %11 = vector.load %arg3[%c0_3, %c0_4] : memref<1x32xf32, #tpu.memory_space<vmem>>, vector<1x32xf32>
    %12 = vector.broadcast %11 : vector<1x32xf32> to vector<16x32xf32>
    %13 = arith.mulf %10, %12 : vector<16x32xf32>
    %14 = arith.truncf %13 : vector<16x32xf32> to vector<16x32xbf16>
    %c0_5 = arith.constant 0 : index
    %c0_6 = arith.constant 0 : index
    %15 = vector.load %arg5[%c0_5, %c0_6] : memref<32x96xbf16, #tpu.memory_space<vmem>>, vector<32x96xbf16>
    %cst_7 = arith.constant dense<0.000000e+00> : vector<16x96xf32>
    %16 = tpu.matmul %14, %15, %cst_7 {dimension_numbers = #tpu.dot_dimension_numbers<[1], [0], [0], [1], [0, 0, 1, 1], [], []>} : vector<16x32xbf16>, vector<32x96xbf16>, vector<16x96xf32> -> vector<16x96xf32>
    %17 = vector.extract_strided_slice %16 {offsets = [0, 0], sizes = [16, 32], strides = [1, 1]} : vector<16x96xf32> to vector<16x32xf32>
    %18 = vector.extract_strided_slice %16 {offsets = [0, 32], sizes = [16, 32], strides = [1, 1]} : vector<16x96xf32> to vector<16x32xf32>
    %19 = vector.extract_strided_slice %16 {offsets = [0, 64], sizes = [16, 32], strides = [1, 1]} : vector<16x96xf32> to vector<16x32xf32>
    %20 = tpu.iota {dimensions = array<i32: 0>} : vector<16x32xi32>
    %c8_i32 = arith.constant 8 : i32
    %c0_i32 = arith.constant 0 : i32
    %21 = arith.cmpi eq, %c8_i32, %c0_i32 : i32
    %c1_i32 = arith.constant 1 : i32
    %22 = arith.select %21, %c1_i32, %c8_i32 : i32
    %23 = vector.broadcast %22 : i32 to vector<16x32xi32>
    %24 = arith.remsi %20, %23 : vector<16x32xi32>
    %c0_i32_8 = arith.constant 0 : i32
    %25 = vector.broadcast %c0_i32_8 : i32 to vector<16x32xi32>
    %26 = arith.cmpi ne, %24, %25 : vector<16x32xi32>
    %c0_i32_9 = arith.constant 0 : i32
    %27 = vector.broadcast %c0_i32_9 : i32 to vector<16x32xi32>
    %28 = arith.cmpi slt, %24, %27 : vector<16x32xi32>
    %c0_i32_10 = arith.constant 0 : i32
    %29 = arith.cmpi slt, %22, %c0_i32_10 : i32
    %30 = vector.broadcast %29 : i1 to vector<16x32xi1>
    %31 = vector.broadcast %30 : vector<16x32xi1> to vector<16x32xi1>
    %32 = arith.xori %28, %31 : vector<16x32xi1>
    %33 = arith.andi %32, %26 : vector<16x32xi1>
    %34 = vector.broadcast %22 : i32 to vector<16x32xi32>
    %35 = arith.addi %24, %34 : vector<16x32xi32>
    %36 = arith.select %33, %35, %24 : vector<16x32xi1>, vector<16x32xi32>
    %37 = arith.sitofp %36 : vector<16x32xi32> to vector<16x32xf32>
    %38 = tpu.iota {dimensions = array<i32: 1>} : vector<16x32xi32>
    %c8_i32_11 = arith.constant 8 : i32
    %c0_i32_12 = arith.constant 0 : i32
    %39 = arith.cmpi eq, %c8_i32_11, %c0_i32_12 : i32
    %c1_i32_13 = arith.constant 1 : i32
    %40 = arith.select %39, %c1_i32_13, %c8_i32_11 : i32
    %41 = vector.broadcast %40 : i32 to vector<16x32xi32>
    %42 = arith.remsi %38, %41 : vector<16x32xi32>
    %c0_i32_14 = arith.constant 0 : i32
    %43 = vector.broadcast %c0_i32_14 : i32 to vector<16x32xi32>
    %44 = arith.cmpi ne, %42, %43 : vector<16x32xi32>
    %c0_i32_15 = arith.constant 0 : i32
    %45 = vector.broadcast %c0_i32_15 : i32 to vector<16x32xi32>
    %46 = arith.cmpi slt, %42, %45 : vector<16x32xi32>
    %c0_i32_16 = arith.constant 0 : i32
    %47 = arith.cmpi slt, %40, %c0_i32_16 : i32
    %48 = vector.broadcast %47 : i1 to vector<16x32xi1>
    %49 = vector.broadcast %48 : vector<16x32xi1> to vector<16x32xi1>
    %50 = arith.xori %46, %49 : vector<16x32xi1>
    %51 = arith.andi %50, %44 : vector<16x32xi1>
    %52 = vector.broadcast %40 : i32 to vector<16x32xi32>
    %53 = arith.addi %42, %52 : vector<16x32xi32>
    %54 = arith.select %51, %53, %42 : vector<16x32xi1>, vector<16x32xi32>
    %c4_i32 = arith.constant 4 : i32
    %55 = vector.broadcast %c4_i32 : i32 to vector<16x32xi32>
    %56 = arith.cmpi slt, %54, %55 : vector<16x32xi32>
    %c4_i32_17 = arith.constant 4 : i32
    %57 = vector.broadcast %c4_i32_17 : i32 to vector<16x32xi32>
    %58 = arith.subi %54, %57 : vector<16x32xi32>
    %59 = arith.select %56, %54, %58 : vector<16x32xi1>, vector<16x32xi32>
    %60 = arith.sitofp %59 : vector<16x32xi32> to vector<16x32xf32>
    %cst_18 = arith.constant -2.30258512 : f32
    %61 = vector.broadcast %cst_18 : f32 to vector<16x32xf32>
    %62 = arith.mulf %60, %61 : vector<16x32xf32>
    %63 = math.exp %62 : vector<16x32xf32>
    %64 = arith.mulf %37, %63 : vector<16x32xf32>
    %65 = math.cos %64 : vector<16x32xf32>
    %66 = math.sin %64 : vector<16x32xf32>
    %c0_19 = arith.constant 0 : index
    %c0_20 = arith.constant 0 : index
    %67 = vector.load %arg2[%c0_19, %c0_20] : memref<32x32xf32, #tpu.memory_space<vmem>>, vector<32x32xf32>
    %68 = arith.mulf %17, %65 : vector<16x32xf32>
    %cst_21 = arith.constant dense<0.000000e+00> : vector<16x32xf32>
    %69 = tpu.matmul %17, %67, %cst_21 {dimension_numbers = #tpu.dot_dimension_numbers<[1], [0], [0], [1], [0, 0, 1, 1], [], []>} : vector<16x32xf32>, vector<32x32xf32>, vector<16x32xf32> -> vector<16x32xf32>
    %70 = arith.mulf %69, %66 : vector<16x32xf32>
    %71 = arith.addf %68, %70 : vector<16x32xf32>
    %72 = arith.mulf %18, %65 : vector<16x32xf32>
    %cst_22 = arith.constant dense<0.000000e+00> : vector<16x32xf32>
    %73 = tpu.matmul %18, %67, %cst_22 {dimension_numbers = #tpu.dot_dimension_numbers<[1], [0], [0], [1], [0, 0, 1, 1], [], []>} : vector<16x32xf32>, vector<32x32xf32>, vector<16x32xf32> -> vector<16x32xf32>
    %74 = arith.mulf %73, %66 : vector<16x32xf32>
    %75 = arith.addf %72, %74 : vector<16x32xf32>
    %76 = tpu.iota {dimensions = array<i32: 0>} : vector<8x8xi32>
    %77 = tpu.iota {dimensions = array<i32: 1>} : vector<8x8xi32>
    %78 = arith.cmpi sle, %77, %76 : vector<8x8xi32>
    %79 = vector.extract_strided_slice %71 {offsets = [0, 0], sizes = [8, 8], strides = [1, 1]} : vector<16x32xf32> to vector<8x8xf32>
    %80 = vector.extract_strided_slice %75 {offsets = [0, 0], sizes = [8, 8], strides = [1, 1]} : vector<16x32xf32> to vector<8x8xf32>
    %81 = vector.extract_strided_slice %19 {offsets = [0, 0], sizes = [8, 8], strides = [1, 1]} : vector<16x32xf32> to vector<8x8xf32>
    %cst_23 = arith.constant dense<0.000000e+00> : vector<8x8xf32>
    %82 = tpu.matmul %79, %80, %cst_23 {dimension_numbers = #tpu.dot_dimension_numbers<[1], [1], [0], [0], [0, 0, 1, 0], [], []>} : vector<8x8xf32>, vector<8x8xf32>, vector<8x8xf32> -> vector<8x8xf32>
    %cst_24 = arith.constant 0.353553385 : f32
    %83 = vector.broadcast %cst_24 : f32 to vector<8x8xf32>
    %84 = arith.mulf %82, %83 : vector<8x8xf32>
    %cst_25 = arith.constant -3.40282347E+38 : f32
    %85 = vector.broadcast %cst_25 : f32 to vector<8x8xf32>
    %86 = arith.select %78, %84, %85 : vector<8x8xi1>, vector<8x8xf32>
    %cst_26 = arith.constant dense<0xFF800000> : vector<8xf32>
    %87 = vector.multi_reduction <maximumf>, %86, %cst_26 [1] : vector<8x8xf32> to vector<8xf32>
    %88 = vector.shape_cast %87 : vector<8xf32> to vector<8x1xf32>
    %89 = vector.broadcast %88 : vector<8x1xf32> to vector<8x8xf32>
    %90 = arith.subf %86, %89 : vector<8x8xf32>
    %91 = math.exp %90 : vector<8x8xf32>
    %cst_27 = arith.constant dense<0.000000e+00> : vector<8xf32>
    %92 = vector.multi_reduction <add>, %91, %cst_27 [1] : vector<8x8xf32> to vector<8xf32>
    %93 = vector.shape_cast %92 : vector<8xf32> to vector<8x1xf32>
    %94 = vector.broadcast %93 : vector<8x1xf32> to vector<8x8xf32>
    %95 = arith.divf %91, %94 : vector<8x8xf32>
    %96 = arith.truncf %95 : vector<8x8xf32> to vector<8x8xbf16>
    %97 = arith.truncf %81 : vector<8x8xf32> to vector<8x8xbf16>
    %cst_28 = arith.constant dense<0.000000e+00> : vector<8x8xf32>
    %98 = tpu.matmul %96, %97, %cst_28 {dimension_numbers = #tpu.dot_dimension_numbers<[1], [0], [0], [1], [0, 0, 1, 1], [], []>} : vector<8x8xbf16>, vector<8x8xbf16>, vector<8x8xf32> -> vector<8x8xf32>
    %99 = arith.truncf %98 : vector<8x8xf32> to vector<8x8xbf16>
    %c0_29 = arith.constant 0 : index
    %c0_30 = arith.constant 0 : index
    %100 = vector.load %arg6[%c0_29, %c0_30] : memref<32x32xbf16, #tpu.memory_space<vmem>>, vector<8x32xbf16>
    %cst_31 = arith.constant dense<0.000000e+00> : vector<8x32xf32>
    %101 = tpu.matmul %99, %100, %cst_31 {dimension_numbers = #tpu.dot_dimension_numbers<[1], [0], [0], [1], [0, 0, 1, 1], [], []>} : vector<8x8xbf16>, vector<8x32xbf16>, vector<8x32xf32> -> vector<8x32xf32>
    %102 = vector.extract_strided_slice %71 {offsets = [0, 8], sizes = [8, 8], strides = [1, 1]} : vector<16x32xf32> to vector<8x8xf32>
    %103 = vector.extract_strided_slice %75 {offsets = [0, 8], sizes = [8, 8], strides = [1, 1]} : vector<16x32xf32> to vector<8x8xf32>
    %104 = vector.extract_strided_slice %19 {offsets = [0, 8], sizes = [8, 8], strides = [1, 1]} : vector<16x32xf32> to vector<8x8xf32>
    %cst_32 = arith.constant dense<0.000000e+00> : vector<8x8xf32>
    %105 = tpu.matmul %102, %103, %cst_32 {dimension_numbers = #tpu.dot_dimension_numbers<[1], [1], [0], [0], [0, 0, 1, 0], [], []>} : vector<8x8xf32>, vector<8x8xf32>, vector<8x8xf32> -> vector<8x8xf32>
    %cst_33 = arith.constant 0.353553385 : f32
    %106 = vector.broadcast %cst_33 : f32 to vector<8x8xf32>
    %107 = arith.mulf %105, %106 : vector<8x8xf32>
    %cst_34 = arith.constant -3.40282347E+38 : f32
    %108 = vector.broadcast %cst_34 : f32 to vector<8x8xf32>
    %109 = arith.select %78, %107, %108 : vector<8x8xi1>, vector<8x8xf32>
    %cst_35 = arith.constant dense<0xFF800000> : vector<8xf32>
    %110 = vector.multi_reduction <maximumf>, %109, %cst_35 [1] : vector<8x8xf32> to vector<8xf32>
    %111 = vector.shape_cast %110 : vector<8xf32> to vector<8x1xf32>
    %112 = vector.broadcast %111 : vector<8x1xf32> to vector<8x8xf32>
    %113 = arith.subf %109, %112 : vector<8x8xf32>
    %114 = math.exp %113 : vector<8x8xf32>
    %cst_36 = arith.constant dense<0.000000e+00> : vector<8xf32>
    %115 = vector.multi_reduction <add>, %114, %cst_36 [1] : vector<8x8xf32> to vector<8xf32>
    %116 = vector.shape_cast %115 : vector<8xf32> to vector<8x1xf32>
    %117 = vector.broadcast %116 : vector<8x1xf32> to vector<8x8xf32>
    %118 = arith.divf %114, %117 : vector<8x8xf32>
    %119 = arith.truncf %118 : vector<8x8xf32> to vector<8x8xbf16>
    %120 = arith.truncf %104 : vector<8x8xf32> to vector<8x8xbf16>
    %cst_37 = arith.constant dense<0.000000e+00> : vector<8x8xf32>
    %121 = tpu.matmul %119, %120, %cst_37 {dimension_numbers = #tpu.dot_dimension_numbers<[1], [0], [0], [1], [0, 0, 1, 1], [], []>} : vector<8x8xbf16>, vector<8x8xbf16>, vector<8x8xf32> -> vector<8x8xf32>
    %122 = arith.truncf %121 : vector<8x8xf32> to vector<8x8xbf16>
    %c8 = arith.constant 8 : index
    %c0_38 = arith.constant 0 : index
    %123 = vector.load %arg6[%c8, %c0_38] : memref<32x32xbf16, #tpu.memory_space<vmem>>, vector<8x32xbf16>
    %cst_39 = arith.constant dense<0.000000e+00> : vector<8x32xf32>
    %124 = tpu.matmul %122, %123, %cst_39 {dimension_numbers = #tpu.dot_dimension_numbers<[1], [0], [0], [1], [0, 0, 1, 1], [], []>} : vector<8x8xbf16>, vector<8x32xbf16>, vector<8x32xf32> -> vector<8x32xf32>
    %125 = arith.addf %101, %124 : vector<8x32xf32>
    %126 = vector.extract_strided_slice %71 {offsets = [0, 16], sizes = [8, 8], strides = [1, 1]} : vector<16x32xf32> to vector<8x8xf32>
    %127 = vector.extract_strided_slice %75 {offsets = [0, 16], sizes = [8, 8], strides = [1, 1]} : vector<16x32xf32> to vector<8x8xf32>
    %128 = vector.extract_strided_slice %19 {offsets = [0, 16], sizes = [8, 8], strides = [1, 1]} : vector<16x32xf32> to vector<8x8xf32>
    %cst_40 = arith.constant dense<0.000000e+00> : vector<8x8xf32>
    %129 = tpu.matmul %126, %127, %cst_40 {dimension_numbers = #tpu.dot_dimension_numbers<[1], [1], [0], [0], [0, 0, 1, 0], [], []>} : vector<8x8xf32>, vector<8x8xf32>, vector<8x8xf32> -> vector<8x8xf32>
    %cst_41 = arith.constant 0.353553385 : f32
    %130 = vector.broadcast %cst_41 : f32 to vector<8x8xf32>
    %131 = arith.mulf %129, %130 : vector<8x8xf32>
    %cst_42 = arith.constant -3.40282347E+38 : f32
    %132 = vector.broadcast %cst_42 : f32 to vector<8x8xf32>
    %133 = arith.select %78, %131, %132 : vector<8x8xi1>, vector<8x8xf32>
    %cst_43 = arith.constant dense<0xFF800000> : vector<8xf32>
    %134 = vector.multi_reduction <maximumf>, %133, %cst_43 [1] : vector<8x8xf32> to vector<8xf32>
    %135 = vector.shape_cast %134 : vector<8xf32> to vector<8x1xf32>
    %136 = vector.broadcast %135 : vector<8x1xf32> to vector<8x8xf32>
    %137 = arith.subf %133, %136 : vector<8x8xf32>
    %138 = math.exp %137 : vector<8x8xf32>
    %cst_44 = arith.constant dense<0.000000e+00> : vector<8xf32>
    %139 = vector.multi_reduction <add>, %138, %cst_44 [1] : vector<8x8xf32> to vector<8xf32>
    %140 = vector.shape_cast %139 : vector<8xf32> to vector<8x1xf32>
    %141 = vector.broadcast %140 : vector<8x1xf32> to vector<8x8xf32>
    %142 = arith.divf %138, %141 : vector<8x8xf32>
    %143 = arith.truncf %142 : vector<8x8xf32> to vector<8x8xbf16>
    %144 = arith.truncf %128 : vector<8x8xf32> to vector<8x8xbf16>
    %cst_45 = arith.constant dense<0.000000e+00> : vector<8x8xf32>
    %145 = tpu.matmul %143, %144, %cst_45 {dimension_numbers = #tpu.dot_dimension_numbers<[1], [0], [0], [1], [0, 0, 1, 1], [], []>} : vector<8x8xbf16>, vector<8x8xbf16>, vector<8x8xf32> -> vector<8x8xf32>
    %146 = arith.truncf %145 : vector<8x8xf32> to vector<8x8xbf16>
    %c16 = arith.constant 16 : index
    %c0_46 = arith.constant 0 : index
    %147 = vector.load %arg6[%c16, %c0_46] : memref<32x32xbf16, #tpu.memory_space<vmem>>, vector<8x32xbf16>
    %cst_47 = arith.constant dense<0.000000e+00> : vector<8x32xf32>
    %148 = tpu.matmul %146, %147, %cst_47 {dimension_numbers = #tpu.dot_dimension_numbers<[1], [0], [0], [1], [0, 0, 1, 1], [], []>} : vector<8x8xbf16>, vector<8x32xbf16>, vector<8x32xf32> -> vector<8x32xf32>
    %149 = arith.addf %125, %148 : vector<8x32xf32>
    %150 = vector.extract_strided_slice %71 {offsets = [0, 24], sizes = [8, 8], strides = [1, 1]} : vector<16x32xf32> to vector<8x8xf32>
    %151 = vector.extract_strided_slice %75 {offsets = [0, 24], sizes = [8, 8], strides = [1, 1]} : vector<16x32xf32> to vector<8x8xf32>
    %152 = vector.extract_strided_slice %19 {offsets = [0, 24], sizes = [8, 8], strides = [1, 1]} : vector<16x32xf32> to vector<8x8xf32>
    %cst_48 = arith.constant dense<0.000000e+00> : vector<8x8xf32>
    %153 = tpu.matmul %150, %151, %cst_48 {dimension_numbers = #tpu.dot_dimension_numbers<[1], [1], [0], [0], [0, 0, 1, 0], [], []>} : vector<8x8xf32>, vector<8x8xf32>, vector<8x8xf32> -> vector<8x8xf32>
    %cst_49 = arith.constant 0.353553385 : f32
    %154 = vector.broadcast %cst_49 : f32 to vector<8x8xf32>
    %155 = arith.mulf %153, %154 : vector<8x8xf32>
    %cst_50 = arith.constant -3.40282347E+38 : f32
    %156 = vector.broadcast %cst_50 : f32 to vector<8x8xf32>
    %157 = arith.select %78, %155, %156 : vector<8x8xi1>, vector<8x8xf32>
    %cst_51 = arith.constant dense<0xFF800000> : vector<8xf32>
    %158 = vector.multi_reduction <maximumf>, %157, %cst_51 [1] : vector<8x8xf32> to vector<8xf32>
    %159 = vector.shape_cast %158 : vector<8xf32> to vector<8x1xf32>
    %160 = vector.broadcast %159 : vector<8x1xf32> to vector<8x8xf32>
    %161 = arith.subf %157, %160 : vector<8x8xf32>
    %162 = math.exp %161 : vector<8x8xf32>
    %cst_52 = arith.constant dense<0.000000e+00> : vector<8xf32>
    %163 = vector.multi_reduction <add>, %162, %cst_52 [1] : vector<8x8xf32> to vector<8xf32>
    %164 = vector.shape_cast %163 : vector<8xf32> to vector<8x1xf32>
    %165 = vector.broadcast %164 : vector<8x1xf32> to vector<8x8xf32>
    %166 = arith.divf %162, %165 : vector<8x8xf32>
    %167 = arith.truncf %166 : vector<8x8xf32> to vector<8x8xbf16>
    %168 = arith.truncf %152 : vector<8x8xf32> to vector<8x8xbf16>
    %cst_53 = arith.constant dense<0.000000e+00> : vector<8x8xf32>
    %169 = tpu.matmul %167, %168, %cst_53 {dimension_numbers = #tpu.dot_dimension_numbers<[1], [0], [0], [1], [0, 0, 1, 1], [], []>} : vector<8x8xbf16>, vector<8x8xbf16>, vector<8x8xf32> -> vector<8x8xf32>
    %170 = arith.truncf %169 : vector<8x8xf32> to vector<8x8xbf16>
    %c24 = arith.constant 24 : index
    %c0_54 = arith.constant 0 : index
    %171 = vector.load %arg6[%c24, %c0_54] : memref<32x32xbf16, #tpu.memory_space<vmem>>, vector<8x32xbf16>
    %cst_55 = arith.constant dense<0.000000e+00> : vector<8x32xf32>
    %172 = tpu.matmul %170, %171, %cst_55 {dimension_numbers = #tpu.dot_dimension_numbers<[1], [0], [0], [1], [0, 0, 1, 1], [], []>} : vector<8x8xbf16>, vector<8x32xbf16>, vector<8x32xf32> -> vector<8x32xf32>
    %173 = arith.addf %149, %172 : vector<8x32xf32>
    %c0_56 = arith.constant 0 : index
    %c0_57 = arith.constant 0 : index
    %174 = vector.load %arg10[%c0_56, %c0_57] : memref<16x32xf32, #tpu.memory_space<vmem>>, vector<8x32xf32>
    tpu.vector_store %arg10[%c0_56, %c0_57], %173 {strides = array<i32>} : memref<16x32xf32, #tpu.memory_space<vmem>>, vector<8x32xf32>,
    %175 = vector.extract_strided_slice %71 {offsets = [8, 0], sizes = [8, 8], strides = [1, 1]} : vector<16x32xf32> to vector<8x8xf32>
    %176 = vector.extract_strided_slice %75 {offsets = [8, 0], sizes = [8, 8], strides = [1, 1]} : vector<16x32xf32> to vector<8x8xf32>
    %177 = vector.extract_strided_slice %19 {offsets = [8, 0], sizes = [8, 8], strides = [1, 1]} : vector<16x32xf32> to vector<8x8xf32>
    %cst_58 = arith.constant dense<0.000000e+00> : vector<8x8xf32>
    %178 = tpu.matmul %175, %176, %cst_58 {dimension_numbers = #tpu.dot_dimension_numbers<[1], [1], [0], [0], [0, 0, 1, 0], [], []>} : vector<8x8xf32>, vector<8x8xf32>, vector<8x8xf32> -> vector<8x8xf32>
    %cst_59 = arith.constant 0.353553385 : f32
    %179 = vector.broadcast %cst_59 : f32 to vector<8x8xf32>
    %180 = arith.mulf %178, %179 : vector<8x8xf32>
    %cst_60 = arith.constant -3.40282347E+38 : f32
    %181 = vector.broadcast %cst_60 : f32 to vector<8x8xf32>
    %182 = arith.select %78, %180, %181 : vector<8x8xi1>, vector<8x8xf32>
    %cst_61 = arith.constant dense<0xFF800000> : vector<8xf32>
    %183 = vector.multi_reduction <maximumf>, %182, %cst_61 [1] : vector<8x8xf32> to vector<8xf32>
    %184 = vector.shape_cast %183 : vector<8xf32> to vector<8x1xf32>
    %185 = vector.broadcast %184 : vector<8x1xf32> to vector<8x8xf32>
    %186 = arith.subf %182, %185 : vector<8x8xf32>
    %187 = math.exp %186 : vector<8x8xf32>
    %cst_62 = arith.constant dense<0.000000e+00> : vector<8xf32>
    %188 = vector.multi_reduction <add>, %187, %cst_62 [1] : vector<8x8xf32> to vector<8xf32>
    %189 = vector.shape_cast %188 : vector<8xf32> to vector<8x1xf32>
    %190 = vector.broadcast %189 : vector<8x1xf32> to vector<8x8xf32>
    %191 = arith.divf %187, %190 : vector<8x8xf32>
    %192 = arith.truncf %191 : vector<8x8xf32> to vector<8x8xbf16>
    %193 = arith.truncf %177 : vector<8x8xf32> to vector<8x8xbf16>
    %cst_63 = arith.constant dense<0.000000e+00> : vector<8x8xf32>
    %194 = tpu.matmul %192, %193, %cst_63 {dimension_numbers = #tpu.dot_dimension_numbers<[1], [0], [0], [1], [0, 0, 1, 1], [], []>} : vector<8x8xbf16>, vector<8x8xbf16>, vector<8x8xf32> -> vector<8x8xf32>
    %195 = arith.truncf %194 : vector<8x8xf32> to vector<8x8xbf16>
    %c0_64 = arith.constant 0 : index
    %c0_65 = arith.constant 0 : index
    %196 = vector.load %arg6[%c0_64, %c0_65] : memref<32x32xbf16, #tpu.memory_space<vmem>>, vector<8x32xbf16>
    %cst_66 = arith.constant dense<0.000000e+00> : vector<8x32xf32>
    %197 = tpu.matmul %195, %196, %cst_66 {dimension_numbers = #tpu.dot_dimension_numbers<[1], [0], [0], [1], [0, 0, 1, 1], [], []>} : vector<8x8xbf16>, vector<8x32xbf16>, vector<8x32xf32> -> vector<8x32xf32>
    %198 = vector.extract_strided_slice %71 {offsets = [8, 8], sizes = [8, 8], strides = [1, 1]} : vector<16x32xf32> to vector<8x8xf32>
    %199 = vector.extract_strided_slice %75 {offsets = [8, 8], sizes = [8, 8], strides = [1, 1]} : vector<16x32xf32> to vector<8x8xf32>
    %200 = vector.extract_strided_slice %19 {offsets = [8, 8], sizes = [8, 8], strides = [1, 1]} : vector<16x32xf32> to vector<8x8xf32>
    %cst_67 = arith.constant dense<0.000000e+00> : vector<8x8xf32>
    %201 = tpu.matmul %198, %199, %cst_67 {dimension_numbers = #tpu.dot_dimension_numbers<[1], [1], [0], [0], [0, 0, 1, 0], [], []>} : vector<8x8xf32>, vector<8x8xf32>, vector<8x8xf32> -> vector<8x8xf32>
    %cst_68 = arith.constant 0.353553385 : f32
    %202 = vector.broadcast %cst_68 : f32 to vector<8x8xf32>
    %203 = arith.mulf %201, %202 : vector<8x8xf32>
    %cst_69 = arith.constant -3.40282347E+38 : f32
    %204 = vector.broadcast %cst_69 : f32 to vector<8x8xf32>
    %205 = arith.select %78, %203, %204 : vector<8x8xi1>, vector<8x8xf32>
    %cst_70 = arith.constant dense<0xFF800000> : vector<8xf32>
    %206 = vector.multi_reduction <maximumf>, %205, %cst_70 [1] : vector<8x8xf32> to vector<8xf32>
    %207 = vector.shape_cast %206 : vector<8xf32> to vector<8x1xf32>
    %208 = vector.broadcast %207 : vector<8x1xf32> to vector<8x8xf32>
    %209 = arith.subf %205, %208 : vector<8x8xf32>
    %210 = math.exp %209 : vector<8x8xf32>
    %cst_71 = arith.constant dense<0.000000e+00> : vector<8xf32>
    %211 = vector.multi_reduction <add>, %210, %cst_71 [1] : vector<8x8xf32> to vector<8xf32>
    %212 = vector.shape_cast %211 : vector<8xf32> to vector<8x1xf32>
    %213 = vector.broadcast %212 : vector<8x1xf32> to vector<8x8xf32>
    %214 = arith.divf %210, %213 : vector<8x8xf32>
    %215 = arith.truncf %214 : vector<8x8xf32> to vector<8x8xbf16>
    %216 = arith.truncf %200 : vector<8x8xf32> to vector<8x8xbf16>
    %cst_72 = arith.constant dense<0.000000e+00> : vector<8x8xf32>
    %217 = tpu.matmul %215, %216, %cst_72 {dimension_numbers = #tpu.dot_dimension_numbers<[1], [0], [0], [1], [0, 0, 1, 1], [], []>} : vector<8x8xbf16>, vector<8x8xbf16>, vector<8x8xf32> -> vector<8x8xf32>
    %218 = arith.truncf %217 : vector<8x8xf32> to vector<8x8xbf16>
    %c8_73 = arith.constant 8 : index
    %c0_74 = arith.constant 0 : index
    %219 = vector.load %arg6[%c8_73, %c0_74] : memref<32x32xbf16, #tpu.memory_space<vmem>>, vector<8x32xbf16>
    %cst_75 = arith.constant dense<0.000000e+00> : vector<8x32xf32>
    %220 = tpu.matmul %218, %219, %cst_75 {dimension_numbers = #tpu.dot_dimension_numbers<[1], [0], [0], [1], [0, 0, 1, 1], [], []>} : vector<8x8xbf16>, vector<8x32xbf16>, vector<8x32xf32> -> vector<8x32xf32>
    %221 = arith.addf %197, %220 : vector<8x32xf32>
    %222 = vector.extract_strided_slice %71 {offsets = [8, 16], sizes = [8, 8], strides = [1, 1]} : vector<16x32xf32> to vector<8x8xf32>
    %223 = vector.extract_strided_slice %75 {offsets = [8, 16], sizes = [8, 8], strides = [1, 1]} : vector<16x32xf32> to vector<8x8xf32>
    %224 = vector.extract_strided_slice %19 {offsets = [8, 16], sizes = [8, 8], strides = [1, 1]} : vector<16x32xf32> to vector<8x8xf32>
    %cst_76 = arith.constant dense<0.000000e+00> : vector<8x8xf32>
    %225 = tpu.matmul %222, %223, %cst_76 {dimension_numbers = #tpu.dot_dimension_numbers<[1], [1], [0], [0], [0, 0, 1, 0], [], []>} : vector<8x8xf32>, vector<8x8xf32>, vector<8x8xf32> -> vector<8x8xf32>
    %cst_77 = arith.constant 0.353553385 : f32
    %226 = vector.broadcast %cst_77 : f32 to vector<8x8xf32>
    %227 = arith.mulf %225, %226 : vector<8x8xf32>
    %cst_78 = arith.constant -3.40282347E+38 : f32
    %228 = vector.broadcast %cst_78 : f32 to vector<8x8xf32>
    %229 = arith.select %78, %227, %228 : vector<8x8xi1>, vector<8x8xf32>
    %cst_79 = arith.constant dense<0xFF800000> : vector<8xf32>
    %230 = vector.multi_reduction <maximumf>, %229, %cst_79 [1] : vector<8x8xf32> to vector<8xf32>
    %231 = vector.shape_cast %230 : vector<8xf32> to vector<8x1xf32>
    %232 = vector.broadcast %231 : vector<8x1xf32> to vector<8x8xf32>
    %233 = arith.subf %229, %232 : vector<8x8xf32>
    %234 = math.exp %233 : vector<8x8xf32>
    %cst_80 = arith.constant dense<0.000000e+00> : vector<8xf32>
    %235 = vector.multi_reduction <add>, %234, %cst_80 [1] : vector<8x8xf32> to vector<8xf32>
    %236 = vector.shape_cast %235 : vector<8xf32> to vector<8x1xf32>
    %237 = vector.broadcast %236 : vector<8x1xf32> to vector<8x8xf32>
    %238 = arith.divf %234, %237 : vector<8x8xf32>
    %239 = arith.truncf %238 : vector<8x8xf32> to vector<8x8xbf16>
    %240 = arith.truncf %224 : vector<8x8xf32> to vector<8x8xbf16>
    %cst_81 = arith.constant dense<0.000000e+00> : vector<8x8xf32>
    %241 = tpu.matmul %239, %240, %cst_81 {dimension_numbers = #tpu.dot_dimension_numbers<[1], [0], [0], [1], [0, 0, 1, 1], [], []>} : vector<8x8xbf16>, vector<8x8xbf16>, vector<8x8xf32> -> vector<8x8xf32>
    %242 = arith.truncf %241 : vector<8x8xf32> to vector<8x8xbf16>
    %c16_82 = arith.constant 16 : index
    %c0_83 = arith.constant 0 : index
    %243 = vector.load %arg6[%c16_82, %c0_83] : memref<32x32xbf16, #tpu.memory_space<vmem>>, vector<8x32xbf16>
    %cst_84 = arith.constant dense<0.000000e+00> : vector<8x32xf32>
    %244 = tpu.matmul %242, %243, %cst_84 {dimension_numbers = #tpu.dot_dimension_numbers<[1], [0], [0], [1], [0, 0, 1, 1], [], []>} : vector<8x8xbf16>, vector<8x32xbf16>, vector<8x32xf32> -> vector<8x32xf32>
    %245 = arith.addf %221, %244 : vector<8x32xf32>
    %246 = vector.extract_strided_slice %71 {offsets = [8, 24], sizes = [8, 8], strides = [1, 1]} : vector<16x32xf32> to vector<8x8xf32>
    %247 = vector.extract_strided_slice %75 {offsets = [8, 24], sizes = [8, 8], strides = [1, 1]} : vector<16x32xf32> to vector<8x8xf32>
    %248 = vector.extract_strided_slice %19 {offsets = [8, 24], sizes = [8, 8], strides = [1, 1]} : vector<16x32xf32> to vector<8x8xf32>
    %cst_85 = arith.constant dense<0.000000e+00> : vector<8x8xf32>
    %249 = tpu.matmul %246, %247, %cst_85 {dimension_numbers = #tpu.dot_dimension_numbers<[1], [1], [0], [0], [0, 0, 1, 0], [], []>} : vector<8x8xf32>, vector<8x8xf32>, vector<8x8xf32> -> vector<8x8xf32>
    %cst_86 = arith.constant 0.353553385 : f32
    %250 = vector.broadcast %cst_86 : f32 to vector<8x8xf32>
    %251 = arith.mulf %249, %250 : vector<8x8xf32>
    %cst_87 = arith.constant -3.40282347E+38 : f32
    %252 = vector.broadcast %cst_87 : f32 to vector<8x8xf32>
    %253 = arith.select %78, %251, %252 : vector<8x8xi1>, vector<8x8xf32>
    %cst_88 = arith.constant dense<0xFF800000> : vector<8xf32>
    %254 = vector.multi_reduction <maximumf>, %253, %cst_88 [1] : vector<8x8xf32> to vector<8xf32>
    %255 = vector.shape_cast %254 : vector<8xf32> to vector<8x1xf32>
    %256 = vector.broadcast %255 : vector<8x1xf32> to vector<8x8xf32>
    %257 = arith.subf %253, %256 : vector<8x8xf32>
    %258 = math.exp %257 : vector<8x8xf32>
    %cst_89 = arith.constant dense<0.000000e+00> : vector<8xf32>
    %259 = vector.multi_reduction <add>, %258, %cst_89 [1] : vector<8x8xf32> to vector<8xf32>
    %260 = vector.shape_cast %259 : vector<8xf32> to vector<8x1xf32>
    %261 = vector.broadcast %260 : vector<8x1xf32> to vector<8x8xf32>
    %262 = arith.divf %258, %261 : vector<8x8xf32>
    %263 = arith.truncf %262 : vector<8x8xf32> to vector<8x8xbf16>
    %264 = arith.truncf %248 : vector<8x8xf32> to vector<8x8xbf16>
    %cst_90 = arith.constant dense<0.000000e+00> : vector<8x8xf32>
    %265 = tpu.matmul %263, %264, %cst_90 {dimension_numbers = #tpu.dot_dimension_numbers<[1], [0], [0], [1], [0, 0, 1, 1], [], []>} : vector<8x8xbf16>, vector<8x8xbf16>, vector<8x8xf32> -> vector<8x8xf32>
    %266 = arith.truncf %265 : vector<8x8xf32> to vector<8x8xbf16>
    %c24_91 = arith.constant 24 : index
    %c0_92 = arith.constant 0 : index
    %267 = vector.load %arg6[%c24_91, %c0_92] : memref<32x32xbf16, #tpu.memory_space<vmem>>, vector<8x32xbf16>
    %cst_93 = arith.constant dense<0.000000e+00> : vector<8x32xf32>
    %268 = tpu.matmul %266, %267, %cst_93 {dimension_numbers = #tpu.dot_dimension_numbers<[1], [0], [0], [1], [0, 0, 1, 1], [], []>} : vector<8x8xbf16>, vector<8x32xbf16>, vector<8x32xf32> -> vector<8x32xf32>
    %269 = arith.addf %245, %268 : vector<8x32xf32>
    %c8_94 = arith.constant 8 : index
    %c0_95 = arith.constant 0 : index
    %270 = vector.load %arg10[%c8_94, %c0_95] : memref<16x32xf32, #tpu.memory_space<vmem>>, vector<8x32xf32>
    tpu.vector_store %arg10[%c8_94, %c0_95], %269 {strides = array<i32>} : memref<16x32xf32, #tpu.memory_space<vmem>>, vector<8x32xf32>,
    %c0_96 = arith.constant 0 : index
    %c0_97 = arith.constant 0 : index
    %271 = vector.load %arg10[%c0_96, %c0_97] : memref<16x32xf32, #tpu.memory_space<vmem>>, vector<16x32xf32>
    %272 = arith.addf %0, %271 : vector<16x32xf32>
    %c0_98 = arith.constant 0 : index
    %c0_99 = arith.constant 0 : index
    %273 = vector.load %arg8[%c0_98, %c0_99] : memref<16x64xf32, #tpu.memory_space<vmem>>, vector<16x32xf32>
    tpu.vector_store %arg8[%c0_98, %c0_99], %272 {strides = array<i32>} : memref<16x64xf32, #tpu.memory_space<vmem>>, vector<16x32xf32>,
    %274 = arith.mulf %272, %272 : vector<16x32xf32>
    %cst_100 = arith.constant dense<0.000000e+00> : vector<16xf32>
    %275 = vector.multi_reduction <add>, %274, %cst_100 [1] : vector<16x32xf32> to vector<16xf32>
    %276 = vector.shape_cast %275 : vector<16xf32> to vector<16x1xf32>
    %cst_101 = arith.constant 3.200000e+01 : f32
    %277 = vector.broadcast %cst_101 : f32 to vector<16x1xf32>
    %278 = arith.divf %276, %277 : vector<16x1xf32>
    %cst_102 = arith.constant 9.99999974E-6 : f32
    %279 = vector.broadcast %cst_102 : f32 to vector<16x1xf32>
    %280 = arith.addf %278, %279 : vector<16x1xf32>
    %281 = math.rsqrt %280 : vector<16x1xf32>
    %282 = vector.broadcast %281 : vector<16x1xf32> to vector<16x32xf32>
    %283 = arith.mulf %272, %282 : vector<16x32xf32>
    %c0_103 = arith.constant 0 : index
    %c0_104 = arith.constant 0 : index
    %284 = vector.load %arg4[%c0_103, %c0_104] : memref<1x32xf32, #tpu.memory_space<vmem>>, vector<1x32xf32>
    %285 = vector.broadcast %284 : vector<1x32xf32> to vector<16x32xf32>
    %286 = arith.mulf %283, %285 : vector<16x32xf32>
    %c0_105 = arith.constant 0 : index
    %c32 = arith.constant 32 : index
    %287 = vector.load %arg8[%c0_105, %c32] : memref<16x64xf32, #tpu.memory_space<vmem>>, vector<16x32xf32>
    tpu.vector_store %arg8[%c0_105, %c32], %286 {strides = array<i32>} : memref<16x64xf32, #tpu.memory_space<vmem>>, vector<16x32xf32>,
    %c0_106 = arith.constant 0 : index
    %c0_107 = arith.constant 0 : index
    %288 = vector.load %arg7[%c0_106, %c0_107] : memref<32x4xf32, #tpu.memory_space<vmem>>, vector<32x4xf32>
    %cst_108 = arith.constant dense<0.000000e+00> : vector<16x4xf32>
    %289 = tpu.matmul %286, %288, %cst_108 {dimension_numbers = #tpu.dot_dimension_numbers<[1], [0], [0], [1], [0, 0, 1, 1], [], []>} : vector<16x32xf32>, vector<32x4xf32>, vector<16x4xf32> -> vector<16x4xf32>
    %c0_109 = arith.constant 0 : index
    %c0_110 = arith.constant 0 : index
    %290 = vector.load %arg9[%c0_109, %c0_110] : memref<16x4xf32, #tpu.memory_space<vmem>>, vector<16x4xf32>
    tpu.vector_store %arg9[%c0_109, %c0_110], %289 {strides = array<i32>} : memref<16x4xf32, #tpu.memory_space<vmem>>, vector<16x4xf32>,
    return
  }
  func.func @transform_0(%arg0: i32) -> (i32, i32) {
    %c0_i32 = arith.constant 0 : i32
    %c0_i32_0 = arith.constant 0 : i32
    %c0_i32_1 = arith.constant 0 : i32
    return %c0_i32, %c0_i32_0 : i32, i32
  }
  func.func @transform_1(%arg0: i32) -> (i32, i32) {
    %c0_i32 = arith.constant 0 : i32
    %c0_i32_0 = arith.constant 0 : i32
    %c0_i32_1 = arith.constant 0 : i32
    return %c0_i32, %c0_i32_0 : i32, i32
  }
  func.func @transform_2(%arg0: i32) -> (i32, i32) {
    %c0_i32 = arith.constant 0 : i32
    %c0_i32_0 = arith.constant 0 : i32
    %c0_i32_1 = arith.constant 0 : i32
    return %c0_i32, %c0_i32_0 : i32, i32
  }
  func.func @transform_3(%arg0: i32) -> (i32, i32) {
    %c0_i32 = arith.constant 0 : i32
    %c0_i32_0 = arith.constant 0 : i32
    %c0_i32_1 = arith.constant 0 : i32
    return %c0_i32, %c0_i32_0 : i32, i32
  }
  func.func @transform_4(%arg0: i32) -> (i32, i32) {
    %c0_i32 = arith.constant 0 : i32
    %c0_i32_0 = arith.constant 0 : i32
    %c0_i32_1 = arith.constant 0 : i32
    return %c0_i32, %c0_i32_0 : i32, i32
  }
  func.func @transform_5(%arg0: i32) -> (i32, i32) {
    %c0_i32 = arith.constant 0 : i32
    %c0_i32_0 = arith.constant 0 : i32
    %c0_i32_1 = arith.constant 0 : i32
    return %c0_i32, %c0_i32_0 : i32, i32
  }
  func.func @transform_6(%arg0: i32) -> (i32, i32) {
    %c0_i32 = arith.constant 0 : i32
    %c0_i32_0 = arith.constant 0 : i32
    %c0_i32_1 = arith.constant 0 : i32
    return %c0_i32, %c0_i32_0 : i32, i32
  }
  func.func @transform_7(%arg0: i32) -> (i32, i32) {
    %c0_i32 = arith.constant 0 : i32
    %c0_i32_0 = arith.constant 0 : i32
    %c0_i32_1 = arith.constant 0 : i32
    return %c0_i32, %c0_i32_0 : i32, i32
  }
  func.func @transform_8(%arg0: i32) -> (i32, i32) {
    %c0_i32 = arith.constant 0 : i32
    %c0_i32_0 = arith.constant 0 : i32
    %c0_i32_1 = arith.constant 0 : i32
    return %c0_i32, %c0_i32_0 : i32, i32
  }
}

module attributes {stable_mosaic.version = 11 : i64} {
  func.func @_lm_head_kernel(%arg0: i32, %arg1: memref<16x32xf32, #tpu.memory_space<vmem>>, %arg2: memref<1x32xf32, #tpu.memory_space<vmem>>, %arg3: memref<32x64xbf16, #tpu.memory_space<vmem>>, %arg4: memref<1x64xf32, #tpu.memory_space<vmem>>, %arg5: memref<16x64xf32, #tpu.memory_space<vmem>>) attributes {dimension_semantics = [#tpu.dimension_semantics<arbitrary>], iteration_bounds = array<i64: 1>, scalar_prefetch = 0 : i64, scratch_operands = 0 : i64, tpu.core_type = #tpu.core_type<tc>, window_params = [{pipeline_mode = #tpu.pipeline_mode<synchronous>, transform_indices = @transform_0, window_bounds = array<i64: 16, 32>}, {pipeline_mode = #tpu.pipeline_mode<synchronous>, transform_indices = @transform_1, window_bounds = array<i64: 1, 32>}, {pipeline_mode = #tpu.pipeline_mode<synchronous>, transform_indices = @transform_2, window_bounds = array<i64: 32, 64>}, {pipeline_mode = #tpu.pipeline_mode<synchronous>, transform_indices = @transform_3, window_bounds = array<i64: 1, 64>}, {pipeline_mode = #tpu.pipeline_mode<synchronous>, transform_indices = @transform_4, window_bounds = array<i64: 16, 64>}]} {
    %c0 = arith.constant 0 : index
    %c0_0 = arith.constant 0 : index
    %0 = vector.load %arg1[%c0, %c0_0] : memref<16x32xf32, #tpu.memory_space<vmem>>, vector<16x32xf32>
    %1 = arith.mulf %0, %0 : vector<16x32xf32>
    %cst = arith.constant dense<0.000000e+00> : vector<16xf32>
    %2 = vector.multi_reduction <add>, %1, %cst [1] : vector<16x32xf32> to vector<16xf32>
    %3 = vector.shape_cast %2 : vector<16xf32> to vector<16x1xf32>
    %cst_1 = arith.constant 3.200000e+01 : f32
    %4 = vector.broadcast %cst_1 : f32 to vector<16x1xf32>
    %5 = arith.divf %3, %4 : vector<16x1xf32>
    %cst_2 = arith.constant 9.99999974E-6 : f32
    %6 = vector.broadcast %cst_2 : f32 to vector<16x1xf32>
    %7 = arith.addf %5, %6 : vector<16x1xf32>
    %8 = math.rsqrt %7 : vector<16x1xf32>
    %9 = vector.broadcast %8 : vector<16x1xf32> to vector<16x32xf32>
    %10 = arith.mulf %0, %9 : vector<16x32xf32>
    %c0_3 = arith.constant 0 : index
    %c0_4 = arith.constant 0 : index
    %11 = vector.load %arg2[%c0_3, %c0_4] : memref<1x32xf32, #tpu.memory_space<vmem>>, vector<1x32xf32>
    %12 = vector.broadcast %11 : vector<1x32xf32> to vector<16x32xf32>
    %13 = arith.mulf %10, %12 : vector<16x32xf32>
    %14 = arith.truncf %13 : vector<16x32xf32> to vector<16x32xbf16>
    %c0_5 = arith.constant 0 : index
    %c0_6 = arith.constant 0 : index
    %15 = vector.load %arg3[%c0_5, %c0_6] : memref<32x64xbf16, #tpu.memory_space<vmem>>, vector<32x64xbf16>
    %cst_7 = arith.constant dense<0.000000e+00> : vector<16x64xf32>
    %16 = tpu.matmul %14, %15, %cst_7 {dimension_numbers = #tpu.dot_dimension_numbers<[1], [0], [0], [1], [0, 0, 1, 1], [], []>} : vector<16x32xbf16>, vector<32x64xbf16>, vector<16x64xf32> -> vector<16x64xf32>
    %c0_8 = arith.constant 0 : index
    %c0_9 = arith.constant 0 : index
    %17 = vector.load %arg4[%c0_8, %c0_9] : memref<1x64xf32, #tpu.memory_space<vmem>>, vector<1x64xf32>
    %18 = vector.broadcast %17 : vector<1x64xf32> to vector<16x64xf32>
    %19 = arith.addf %16, %18 : vector<16x64xf32>
    %c0_10 = arith.constant 0 : index
    %c0_11 = arith.constant 0 : index
    %20 = vector.load %arg5[%c0_10, %c0_11] : memref<16x64xf32, #tpu.memory_space<vmem>>, vector<16x64xf32>
    tpu.vector_store %arg5[%c0_10, %c0_11], %19 {strides = array<i32>} : memref<16x64xf32, #tpu.memory_space<vmem>>, vector<16x64xf32>,
    return
  }
  func.func @transform_0(%arg0: i32) -> (i32, i32) {
    %c0_i32 = arith.constant 0 : i32
    %c0_i32_0 = arith.constant 0 : i32
    %c0_i32_1 = arith.constant 0 : i32
    return %c0_i32, %c0_i32_0 : i32, i32
  }
  func.func @transform_1(%arg0: i32) -> (i32, i32) {
    %c0_i32 = arith.constant 0 : i32
    %c0_i32_0 = arith.constant 0 : i32
    %c0_i32_1 = arith.constant 0 : i32
    return %c0_i32, %c0_i32_0 : i32, i32
  }
  func.func @transform_2(%arg0: i32) -> (i32, i32) {
    %c0_i32 = arith.constant 0 : i32
    %c0_i32_0 = arith.constant 0 : i32
    %c0_i32_1 = arith.constant 0 : i32
    return %c0_i32, %c0_i32_0 : i32, i32
  }
  func.func @transform_3(%arg0: i32) -> (i32, i32) {
    %c0_i32 = arith.constant 0 : i32
    %c0_i32_0 = arith.constant 0 : i32
    %c0_i32_1 = arith.constant 0 : i32
    return %c0_i32, %c0_i32_0 : i32, i32
  }
  func.func @transform_4(%arg0: i32) -> (i32, i32) {
    %c0_i32 = arith.constant 0 : i32
    %c0_i32_0 = arith.constant 0 : i32
    %c0_i32_1 = arith.constant 0 : i32
    return %c0_i32, %c0_i32_0 : i32, i32
  }
}

module attributes {stable_mosaic.version = 11 : i64} {
  func.func @_moe_kernel(%arg0: i32, %arg1: i32, %arg2: memref<16x32xf32, #tpu.memory_space<vmem>>, %arg3: memref<16x32xf32, #tpu.memory_space<vmem>>, %arg4: memref<1x32x64xbf16, #tpu.memory_space<vmem>>, %arg5: memref<1x32x64xbf16, #tpu.memory_space<vmem>>, %arg6: memref<1x64x32xbf16, #tpu.memory_space<vmem>>, %arg7: memref<1x16x1xf32, #tpu.memory_space<vmem>>, %arg8: memref<16x32xf32, #tpu.memory_space<vmem>>) attributes {dimension_semantics = [#tpu.dimension_semantics<parallel>, #tpu.dimension_semantics<arbitrary>], iteration_bounds = array<i64: 1, 4>, scalar_prefetch = 0 : i64, scratch_operands = 0 : i64, tpu.core_type = #tpu.core_type<tc>, window_params = [{transform_indices = @transform_0, window_bounds = array<i64: 16, 32>}, {transform_indices = @transform_1, window_bounds = array<i64: 16, 32>}, {transform_indices = @transform_2, window_bounds = array<i64: 1, 32, 64>}, {transform_indices = @transform_3, window_bounds = array<i64: 1, 32, 64>}, {transform_indices = @transform_4, window_bounds = array<i64: 1, 64, 32>}, {transform_indices = @transform_5, window_bounds = array<i64: 1, 16, 1>}, {transform_indices = @transform_6, window_bounds = array<i64: 16, 32>}]} {
    %c0_i32 = arith.constant 0 : i32
    %0 = arith.cmpi eq, %arg1, %c0_i32 : i32
    %1 = arith.extui %0 : i1 to i32
    %c0_i32_0 = arith.constant 0 : i32
    %2 = arith.cmpi ne, %1, %c0_i32_0 : i32
    scf.if %2 {
      %c0_21 = arith.constant 0 : index
      %c0_22 = arith.constant 0 : index
      %29 = vector.load %arg3[%c0_21, %c0_22] : memref<16x32xf32, #tpu.memory_space<vmem>>, vector<16x32xf32>
      %c0_23 = arith.constant 0 : index
      %c0_24 = arith.constant 0 : index
      %30 = vector.load %arg8[%c0_23, %c0_24] : memref<16x32xf32, #tpu.memory_space<vmem>>, vector<16x32xf32>
      tpu.vector_store %arg8[%c0_23, %c0_24], %29 {strides = array<i32>} : memref<16x32xf32, #tpu.memory_space<vmem>>, vector<16x32xf32>,
    } else {
    }
    %c0 = arith.constant 0 : index
    %c0_1 = arith.constant 0 : index
    %3 = vector.load %arg2[%c0, %c0_1] : memref<16x32xf32, #tpu.memory_space<vmem>>, vector<16x32xf32>
    %4 = arith.truncf %3 : vector<16x32xf32> to vector<16x32xbf16>
    %c0_2 = arith.constant 0 : index
    %c0_3 = arith.constant 0 : index
    %c0_4 = arith.constant 0 : index
    %5 = vector.load %arg4[%c0_2, %c0_3, %c0_4] : memref<1x32x64xbf16, #tpu.memory_space<vmem>>, vector<1x32x64xbf16>
    %6 = vector.shape_cast %5 : vector<1x32x64xbf16> to vector<32x64xbf16>
    %cst = arith.constant dense<0.000000e+00> : vector<16x64xf32>
    %7 = tpu.matmul %4, %6, %cst {dimension_numbers = #tpu.dot_dimension_numbers<[1], [0], [0], [1], [0, 0, 1, 1], [], []>} : vector<16x32xbf16>, vector<32x64xbf16>, vector<16x64xf32> -> vector<16x64xf32>
    %c0_5 = arith.constant 0 : index
    %c0_6 = arith.constant 0 : index
    %c0_7 = arith.constant 0 : index
    %8 = vector.load %arg5[%c0_5, %c0_6, %c0_7] : memref<1x32x64xbf16, #tpu.memory_space<vmem>>, vector<1x32x64xbf16>
    %9 = vector.shape_cast %8 : vector<1x32x64xbf16> to vector<32x64xbf16>
    %cst_8 = arith.constant dense<0.000000e+00> : vector<16x64xf32>
    %10 = tpu.matmul %4, %9, %cst_8 {dimension_numbers = #tpu.dot_dimension_numbers<[1], [0], [0], [1], [0, 0, 1, 1], [], []>} : vector<16x32xbf16>, vector<32x64xbf16>, vector<16x64xf32> -> vector<16x64xf32>
    %11 = arith.negf %7 : vector<16x64xf32>
    %12 = math.exp %11 : vector<16x64xf32>
    %cst_9 = arith.constant 1.000000e+00 : f32
    %13 = vector.broadcast %cst_9 : f32 to vector<16x64xf32>
    %14 = arith.addf %13, %12 : vector<16x64xf32>
    %15 = arith.divf %13, %14 : vector<16x64xf32>
    %16 = arith.mulf %7, %15 : vector<16x64xf32>
    %17 = arith.mulf %16, %10 : vector<16x64xf32>
    %18 = arith.truncf %17 : vector<16x64xf32> to vector<16x64xbf16>
    %c0_10 = arith.constant 0 : index
    %c0_11 = arith.constant 0 : index
    %c0_12 = arith.constant 0 : index
    %19 = vector.load %arg6[%c0_10, %c0_11, %c0_12] : memref<1x64x32xbf16, #tpu.memory_space<vmem>>, vector<1x64x32xbf16>
    %20 = vector.shape_cast %19 : vector<1x64x32xbf16> to vector<64x32xbf16>
    %cst_13 = arith.constant dense<0.000000e+00> : vector<16x32xf32>
    %21 = tpu.matmul %18, %20, %cst_13 {dimension_numbers = #tpu.dot_dimension_numbers<[1], [0], [0], [1], [0, 0, 1, 1], [], []>} : vector<16x64xbf16>, vector<64x32xbf16>, vector<16x32xf32> -> vector<16x32xf32>
    %c0_14 = arith.constant 0 : index
    %c0_15 = arith.constant 0 : index
    %22 = vector.load %arg8[%c0_14, %c0_15] : memref<16x32xf32, #tpu.memory_space<vmem>>, vector<16x32xf32>
    %c0_16 = arith.constant 0 : index
    %c0_17 = arith.constant 0 : index
    %c0_18 = arith.constant 0 : index
    %23 = vector.load %arg7[%c0_16, %c0_17, %c0_18] : memref<1x16x1xf32, #tpu.memory_space<vmem>>, vector<1x16x1xf32>
    %24 = vector.shape_cast %23 : vector<1x16x1xf32> to vector<16x1xf32>
    %25 = vector.broadcast %24 : vector<16x1xf32> to vector<16x32xf32>
    %26 = arith.mulf %21, %25 : vector<16x32xf32>
    %27 = arith.addf %22, %26 : vector<16x32xf32>
    %c0_19 = arith.constant 0 : index
    %c0_20 = arith.constant 0 : index
    %28 = vector.load %arg8[%c0_19, %c0_20] : memref<16x32xf32, #tpu.memory_space<vmem>>, vector<16x32xf32>
    tpu.vector_store %arg8[%c0_19, %c0_20], %27 {strides = array<i32>} : memref<16x32xf32, #tpu.memory_space<vmem>>, vector<16x32xf32>,
    return
  }
  func.func @transform_0(%arg0: i32, %arg1: i32) -> (i32, i32) {
    %c0_i32 = arith.constant 0 : i32
    %c0_i32_0 = arith.constant 0 : i32
    return %arg0, %c0_i32 : i32, i32
  }
  func.func @transform_1(%arg0: i32, %arg1: i32) -> (i32, i32) {
    %c0_i32 = arith.constant 0 : i32
    %c0_i32_0 = arith.constant 0 : i32
    return %arg0, %c0_i32 : i32, i32
  }
  func.func @transform_2(%arg0: i32, %arg1: i32) -> (i32, i32, i32) {
    %c0_i32 = arith.constant 0 : i32
    %c0_i32_0 = arith.constant 0 : i32
    %c0_i32_1 = arith.constant 0 : i32
    return %arg1, %c0_i32, %c0_i32_0 : i32, i32, i32
  }
  func.func @transform_3(%arg0: i32, %arg1: i32) -> (i32, i32, i32) {
    %c0_i32 = arith.constant 0 : i32
    %c0_i32_0 = arith.constant 0 : i32
    %c0_i32_1 = arith.constant 0 : i32
    return %arg1, %c0_i32, %c0_i32_0 : i32, i32, i32
  }
  func.func @transform_4(%arg0: i32, %arg1: i32) -> (i32, i32, i32) {
    %c0_i32 = arith.constant 0 : i32
    %c0_i32_0 = arith.constant 0 : i32
    %c0_i32_1 = arith.constant 0 : i32
    return %arg1, %c0_i32, %c0_i32_0 : i32, i32, i32
  }
  func.func @transform_5(%arg0: i32, %arg1: i32) -> (i32, i32, i32) {
    %c0_i32 = arith.constant 0 : i32
    %c0_i32_0 = arith.constant 0 : i32
    return %arg1, %arg0, %c0_i32 : i32, i32, i32
  }
  func.func @transform_6(%arg0: i32, %arg1: i32) -> (i32, i32) {
    %c0_i32 = arith.constant 0 : i32
    %c0_i32_0 = arith.constant 0 : i32
    return %arg0, %c0_i32 : i32, i32
  }
}

</mosaic_0001>

<bundles_post_ra>
// kernel: mixtral_forward.9
= control target key start
LH: loop header
LB: loop body
LE: loop exit
PB: predicated region body
PF: predicated region fallthrough
CT: control target
= control target key end

     0   :  { %vm22_vm0 = vcmask 261120   ;;  %v133_v6 = vmov 32.0   ;;  %vm106_vm8 = vcmask 523264   ;;  %s186_s0 = inlined_call_operand.vmem [shape: f32[16,32], index: 0, kind: input, shape index: {}]   ;;  %s187_s1 = inlined_call_operand.vmem [shape: f32[1,32], index: 1, kind: input, shape index: {}]   ;;  %s188_s3 = inlined_call_operand.vmem [shape: f32[1,64], index: 3, kind: input, shape index: {}]   ;;  %s189_s2 = inlined_call_operand.vmem [shape: bf16[32,64], index: 2, kind: input, shape index: {}]   ;;  %s190_s4 = inlined_call_operand.vmem [shape: f32[16,64], index: 4, kind: output, shape index: {}]  }
   0x1   :  { %v18_v0 = vld [vmem:[%s186_s0] sm:$0xff]  ;;  %v19_v2 = vld [vmem:[%s186_s0 + $0x8] sm:$0xff]  ;;  %127 = vrcp.f32 %v133_v6 }
   0x2   :  { %v20_v1 = vmul.f32 %v18_v0, %v18_v0  ;;  %v21_v4 = vmul.f32 %v19_v2, %v19_v2  ;;  %v123_v12 = vld [vmem:[%s189_s2 + $0x8] sm:$0xff]  ;;  %v122_v14 = vld [vmem:[%s189_s2] sm:$0xff] }
   0x3   :  { %98 = vmatpush.bf16.msra.mxu0 %v123_v12  ;;  %v125_v35 = vld [vmem:[%s187_s1] ss:$0 sm:$0xff] }
   0x4   :  { %v23_v3 = vsel %vm22_vm0, %v20_v1, 0.0  ;;  %v26_v5 = vsel %vm22_vm0, %v21_v4, 0.0  ;;  %v126_v41 = vld [vmem:[%s188_s3] ss:$0 sm:$0xff] }
   0x5   :  { %24 = vadd.xlane.f32.xlu0 %v23_v3 }
   0x7   :  { %v128_v7 = vpop.eup %127  ;;  %99 = vmatpush.bf16.msra.mxu0 %v122_v14 }
   0x8   :  { %v30_v8 = vmul.f32 32.0, %v128_v7  ;;  %vm34_vm1 = vweird.f32 %v128_v7 }
   0xa   :  { %v31_v9 = vsub.f32 1.0, %v30_v8 }
   0xc   :  { %v32_v10 = vmul.f32 %v128_v7, %v31_v9 }
   0xd   :  { %27 = vadd.xlane.f32.xlu0 %v26_v5 }
   0xe   :  { %v33_v11 = vadd.f32 %v128_v7, %v32_v10 }
  0x10   :  { %v35_v13 = vsel %vm34_vm1, %v128_v7, %v33_v11 }
  0x78   :  { %v25_v15 = vpop.xlane.xlu0 %24 }
  0x79   :  { %v36_v16 = vmul.f32 %v35_v13, %v25_v15 }
  0x7b   :  { %v38_v17 = vadd.f32 1e-05, %v36_v16 }
  0x7d   :  { %129 = vrsqrt.f32 %v38_v17  ;;  %vm46_vm3 = vweird.f32 %v38_v17 }
  0x80   :  { %v28_v18 = vpop.xlane.xlu0 %27 }
  0x81   :  { %v37_v19 = vmul.f32 %v35_v13, %v28_v18 }
  0x83   :  { %v130_v20 = vpop.eup %129  ;;  %v39_v21 = vadd.f32 1e-05, %v37_v19 }
  0x84   :  { %v41_v22 = vmul.f32 %v130_v20, %v38_v17  ;;  %vm47_vm2 = vweird.f32 %v130_v20 }
  0x85   :  { %131 = vrsqrt.f32 %v39_v21  ;;  %vm48_vm4 = vmor %vm46_vm3, %vm47_vm2  ;;  %vm56_vm6 = vweird.f32 %v39_v21 }
  0x86   :  { %v42_v23 = vmul.f32 %v130_v20, %v41_v22 }
  0x88   :  { %v43_v24 = vmul.f32 0.5, %v42_v23 }
  0x8a   :  { %v44_v25 = vsub.f32 1.5, %v43_v24 }
  0x8b   :  { %v132_v26 = vpop.eup %131 }
  0x8c   :  { %v51_v27 = vmul.f32 %v132_v26, %v39_v21  ;;  %v45_v28 = vmul.f32 %v130_v20, %v44_v25  ;;  %vm57_vm5 = vweird.f32 %v132_v26 }
  0x8d   :  { %vm58_vm7 = vmor %vm56_vm6, %vm57_vm5 }
  0x8e   :  { %v52_v29 = vmul.f32 %v132_v26, %v51_v27  ;;  %v49_v31 = vsel %vm48_vm4, %v130_v20, %v45_v28 }
  0x8f   :  { %v60_v34 = vmul.f32 %v49_v31, %v18_v0 }
  0x90   :  { %v53_v30 = vmul.f32 0.5, %v52_v29 }
  0x91   :  { %v66_v38 = vmul.f32 %v125_v35, %v60_v34 }
  0x92   :  { %v54_v32 = vsub.f32 1.5, %v53_v30 }
  0x94   :  { %v55_v33 = vmul.f32 %v132_v26, %v54_v32 }
  0x96   :  { %v59_v36 = vsel %vm58_vm7, %v132_v26, %v55_v33 }
  0x97   :  { %v61_v37 = vmul.f32 %v59_v36, %v19_v2 }
  0x99   :  { %v67_v39 = vmul.f32 %v125_v35, %v61_v37 }
  0x9b   :  { %v68_v40 = vpack.c.bf16 %v67_v39, %v66_v38 }
  0x9d   :  { %121 = vmatmul.msk.bf16.vlgmr.msra.gmra.mxu0 %vm22_vm0, %v68_v40 }
 0x11a   :  { %v101_v42 = vpop.f32.mrf.mxu0 }
 0x11b   :  { %v102_v43 = vadd.f32 %v126_v41, %v101_v42 }
 0x11d   :  { %107 = vst.msk [vmem:[%s190_s4] sm:$0xff] %vm106_vm8, %v102_v43 }
 0x122   :  { %v103_v44 = vpop.f32.mrf.mxu0 }
 0x123   :  { %v104_v45 = vadd.f32 %v126_v41, %v103_v44 }
 0x125   :  { %108 = vst.msk [vmem:[%s190_s4 + $0x8] sm:$0xff] %vm106_vm8, %v104_v45 }

// kernel: mixtral_forward.6
= control target key start
LH: loop header
LB: loop body
LE: loop exit
PB: predicated region body
PF: predicated region fallthrough
CT: control target
= control target key end

     0   :  { %s871_s21 = smov 0   ;;  %s873_s22 = smov 0   ;;  %s954_s0 = inlined_call_operand.vmem [shape: f32[16,32], index: 0, kind: input, shape index: {}]   ;;  %s955_s1 = inlined_call_operand.vmem [shape: f32[16,32], index: 1, kind: input, shape index: {}]   ;;  %s956_s2 = inlined_call_operand.vmem [shape: bf16[4,32,64], index: 2, kind: input, shape index: {}]   ;;  %s957_s3 = inlined_call_operand.vmem [shape: bf16[4,32,64], index: 3, kind: input, shape index: {}]   ;;  %s958_s4 = inlined_call_operand.vmem [shape: bf16[4,64,32], index: 4, kind: input, shape index: {}]   ;;  %s959_s5 = inlined_call_operand.vmem [shape: f32[4,16,1], index: 5, kind: input, shape index: {}]   ;;  %s960_s6 = inlined_call_operand.vmem [shape: f32[16,32], index: 6, kind: output, shape index: {}]  }
   0x1   :  { %s875_s23 = smov 0  }
   0x2 LB: > { %s25_s24 = sadd.s32 1, %s829_s22  ;;  %p714_p0 = scmp.ge.s32.totalorder %s833_s23, 1  ;;  %s833_s23 = sphi %s875_s23, %s16_s23   ;;  %s829_s22 = sphi %s873_s22, %s962_s22   ;;  %s825_s21 = sphi %s871_s21, %s961_s21  }
   0x3   : > { %p26_p1 = scmp.ge.s32.totalorder %s25_s24, 4  ;;  %p283_p2 = scmp.lt.s32.totalorder %s833_s23, 5 }
   0x5   : > { %s964_s24 = smov (%p26_p1, %s25_s24), 0  ;;  %p284_p3 = pnand %p714_p0, %p283_p2 }
   0x6   : > { %p354_p4 = scmp.lt.s32.totalorder (!%p284_p3), %s825_s21, 3  ;;  %p723_p5 = scmp.ne.s32.totalorder (!%p284_p3), %s825_s21, 0 }
   0x7   : > { %287 = sbr.rel (%p284_p3) target bundleno = 342 (0x156), region = 44 }
   0xc   : > { %s355_s25 = scalar_select %p354_p4, %s825_s21, 3 }
   0xd   : > { %389 = sbr.rel (%p723_p5) target bundleno = 21 (0x15), region = 48 }
   0xe   : > { %s765_s26 = sshll.u32 %s355_s25, 4  ;;  %s767_s27 = sshll.u32 %s355_s25, 5 }
   0xf   : > { %s358_s30 = scalar_lea.vmem %s956_s2, %s765_s26  ;;  %s363_s9 = scalar_lea.vmem %s957_s3, %s765_s26 }
  0x10   : > { %s898_s12 = scalar_lea.vmem %s958_s4, %s767_s27  ;;  %s903_s15 = scalar_lea.vmem %s959_s5, %s765_s26 }
  0x12   : > { %v390_v0 = vld [vmem:[%s955_s1] sm:$0xff]  ;;  %vm392_vm0 = vcmask 261120   ;;  %v391_v1 = vld [vmem:[%s955_s1 + $0x8] sm:$0xff] }
  0x13   : > { %393 = vst.msk [vmem:[%s960_s6] sm:$0xff] %vm392_vm0, %v390_v0 }
  0x14   : > { %394 = vst.msk [vmem:[%s960_s6 + $0x8] sm:$0xff] %vm392_vm0, %v391_v1 }
  0x15 PF: > { %v770_v2 = vld [vmem:[%s358_s30 + $0x8] sm:$0xff]  ;;  %v769_v4 = vld [vmem:[%s358_s30] sm:$0xff]  ;;  %vm414_vm1 = vcmask 261120   ;;  %v776_v9 = vld [vmem:[%s898_s12 + $0x18] sm:$0xff]  ;;  %v835_v20 = vmov 0   ;;  %vm537_vm10 = vcmask 523264  }
  0x16   : > { %v772_v3 = vld [vmem:[%s363_s9 + $0x8] sm:$0xff]  ;;  %424 = vmatpush.bf16.msra.mxu0 %v770_v2  ;;  %v395_v5 = vld [vmem:[%s954_s0] sm:$0xff]  ;;  %545 = vmatpush.bf16.msra.mxu2 %v776_v9  ;;  %v775_v10 = vld [vmem:[%s898_s12 + $0x10] sm:$0xff] }
  0x17   : > { %v396_v6 = vld [vmem:[%s954_s0 + $0x8] sm:$0xff]  ;;  %454 = vmatpush.bf16.msra.mxu1 %v772_v3  ;;  %v771_v7 = vld [vmem:[%s363_s9] sm:$0xff]  ;;  %802 = vset.pattern.permute.xlu0 %v835_v20 }
  0x18   : > { %v397_v8 = vpack.c.bf16 %v396_v6, %v395_v5  ;;  %v774_v13 = vld [vmem:[%s898_s12 + $0x8] sm:$0xff]  ;;  %v773_v14 = vld [vmem:[%s898_s12] sm:$0xff] }
  0x19   : > { %v557_v19 = vld [vmem:[%s903_s15] sm:$0xff]  ;;  %v558_v24 = vld [vmem:[%s903_s15 + $0x8] sm:$0xff] }
  0x1a   : > { %425 = vmatpush.bf16.msra.mxu0 %v769_v4  ;;  %546 = vmatpush.bf16.msra.mxu2 %v775_v10  ;;  %v555_v53 = vld [vmem:[%s960_s6] sm:$0xff] }
  0x1b   : > { %455 = vmatpush.bf16.msra.mxu1 %v771_v7  ;;  %561 = vperm.xlu0 %802, %v557_v19   ;;  %v556_v58 = vld [vmem:[%s960_s6 + $0x8] sm:$0xff] }
  0x1d   : > { %732 = vmatmul.msk.bf16.vlgmr.msra.gmra.mxu0 %vm414_vm1, %v397_v8 }
  0x1e   : > { %741 = vmatmul.msk.bf16.vlgmr.msra.gmra.mxu1 %vm414_vm1, %v397_v8  ;;  %547 = vmatpush.bf16.msra.mxu2 %v774_v13 }
  0x22   : > { %548 = vmatpush.bf16.msra.mxu2 %v773_v14 }
  0x23   : > { %566 = vperm.xlu0 %802, %v558_v24  }
  0x8d   : > { %v562_v51 = vpop.permute.xlu0 %561 }
  0x95   : > { %v567_v56 = vpop.permute.xlu0 %566 }
  0x9a   : > { %v427_v11 = vpop.f32.mrf.mxu0 }
  0x9b   : > { %v742_v12 = vmul.f32 -1.442695, %v427_v11  ;;  %v457_v33 = vpop.f32.mrf.mxu1 }
  0x9d   : > { %803 = vpow2.f32 %v742_v12 }
  0xa2   : > { %v429_v15 = vpop.f32.mrf.mxu0 }
  0xa3   : > { %v804_v16 = vpop.eup %803  ;;  %v743_v17 = vmul.f32 -1.442695, %v429_v15  ;;  %v459_v47 = vpop.f32.mrf.mxu1 }
  0xa4   : > { %v468_v18 = vadd.f32 1.0, %v804_v16 }
  0xa5   : > { %805 = vpow2.f32 %v743_v17 }
  0xa6   : > { %807 = vrcp.f32 %v468_v18  ;;  %v481_v30 = vand.u32 2147483648, %v468_v18  ;;  %vm475_vm3 = vweird.f32 %v468_v18  ;;  %v479_v31 = vand.u32 2147483647, %v468_v18 }
  0xa8   : > { %v482_v36 = vor.u32 1.1754944e-38, %v481_v30  ;;  %vm480_vm5 = vcmp.eq.f32.partialorder %v479_v31, 8.507059e+37 }
  0xab   : > { %v806_v21 = vpop.eup %805 }
  0xac   : > { %v808_v22 = vpop.eup %807  ;;  %v469_v23 = vadd.f32 1.0, %v806_v21 }
  0xad   : > { %v471_v25 = vmul.f32 %v808_v22, %v468_v18  ;;  %vm476_vm2 = vweird.f32 %v808_v22 }
  0xae   : > { %809 = vrcp.f32 %v469_v23  ;;  %vm477_vm4 = vmor %vm475_vm3, %vm476_vm2  ;;  %v496_v37 = vand.u32 2147483648, %v469_v23  ;;  %v494_v39 = vand.u32 2147483647, %v469_v23  ;;  %vm490_vm7 = vweird.f32 %v469_v23 }
  0xaf   : > { %v472_v26 = vsub.f32 1.0, %v471_v25 }
  0xb0   : > { %v497_v42 = vor.u32 1.1754944e-38, %v496_v37  ;;  %vm495_vm9 = vcmp.eq.f32.partialorder %v494_v39, 8.507059e+37 }
  0xb1   : > { %v473_v27 = vmul.f32 %v808_v22, %v472_v26 }
  0xb3   : > { %v474_v28 = vadd.f32 %v808_v22, %v473_v27 }
  0xb4   : > { %v810_v29 = vpop.eup %809 }
  0xb5   : > { %v486_v32 = vmul.f32 %v810_v29, %v469_v23  ;;  %v478_v34 = vsel %vm477_vm4, %v808_v22, %v474_v28  ;;  %vm491_vm6 = vweird.f32 %v810_v29 }
  0xb6   : > { %v483_v40 = vsel %vm480_vm5, %v482_v36, %v478_v34  ;;  %vm492_vm8 = vmor %vm490_vm7, %vm491_vm6 }
  0xb7   : > { %v487_v35 = vsub.f32 1.0, %v486_v32  ;;  %v500_v43 = vmul.f32 %v483_v40, %v427_v11 }
  0xb9   : > { %v488_v38 = vmul.f32 %v810_v29, %v487_v35  ;;  %v502_v48 = vmul.f32 %v500_v43, %v457_v33 }
  0xbb   : > { %v489_v41 = vadd.f32 %v810_v29, %v488_v38 }
  0xbd   : > { %v493_v44 = vsel %vm492_vm8, %v810_v29, %v489_v41 }
  0xbe   : > { %v498_v45 = vsel %vm495_vm9, %v497_v42, %v493_v44 }
  0xbf   : > { %v501_v46 = vmul.f32 %v498_v45, %v429_v15 }
  0xc1   : > { %v503_v49 = vmul.f32 %v501_v46, %v459_v47 }
  0xc3   : > { %v504_v50 = vpack.c.bf16 %v503_v49, %v502_v48 }
  0xc5   : > { %760 = vmatmul.msk.bf16.vlgmr.msra.gmra.mxu2 %vm537_vm10, %v504_v50 }
 0x148   : > { %v550_v52 = vpop.f32.mrf.mxu2 }
 0x149   : > { %v569_v54 = vmul.f32 %v562_v51, %v550_v52 }
 0x14b   : > { %v571_v55 = vadd.f32 %v569_v54, %v555_v53 }
 0x14d   : > { %573 = vst.msk [vmem:[%s960_s6] sm:$0xff] %vm414_vm1, %v571_v55 }
 0x150   : > { %v552_v57 = vpop.f32.mrf.mxu2 }
 0x151   : > { %v570_v59 = vmul.f32 %v567_v56, %v552_v57 }
 0x153   : > { %v572_v60 = vadd.f32 %v570_v59, %v556_v58 }
 0x155   : > { %574 = vst.msk [vmem:[%s960_s6 + $0x8] sm:$0xff] %vm414_vm1, %v572_v60 }
 0x156 PF: > { %s16_s23 = sadd.s32 1, %s833_s23   ;;  %s961_s21 = smov %s829_s22 }
 0x157   : > { %p13_p6 = scmp.ge.s32.totalorder %s16_s23, 6   ;;  %s962_s22 = smov %s964_s24 }
 0x159   :  { %15 = sbr.rel (!%p13_p6) target bundleno = 2 (0x2), region = 93 }

// kernel: mixtral_forward.5
= control target key start
LH: loop header
LB: loop body
LE: loop exit
PB: predicated region body
PF: predicated region fallthrough
CT: control target
= control target key end

     0   :  { %vm33_vm0 = vcmask 261120   ;;  %v1893_v6 = vmov 32.0   ;;  %v113_v25 = vlaneseq  ;;  %s1902_s21 = smov 32   ;;  %s1903_s22 = smov 120   ;;  %s2505_s0 = inlined_call_operand.vmem [shape: f32[16,32], index: 0, kind: input, shape index: {}]   ;;  %s2506_s2 = inlined_call_operand.vmem [shape: f32[1,32], index: 2, kind: input, shape index: {}]   ;;  %s2507_s4 = inlined_call_operand.vmem [shape: bf16[32,96], index: 4, kind: input, shape index: {}]   ;;  %s2508_s1 = inlined_call_operand.vmem [shape: f32[32,32], index: 1, kind: input, shape index: {}]   ;;  %s2509_s5 = inlined_call_operand.vmem [shape: bf16[32,32], index: 5, kind: input, shape index: {}]   ;;  %s2510_s7 = inlined_call_operand.vmem [shape: f32[16,64], index: 7, kind: output, shape index: {0}]   ;;  %s2511_s3 = inlined_call_operand.vmem [shape: f32[1,32], index: 3, kind: input, shape index: {}]   ;;  %s2512_s6 = inlined_call_operand.vmem [shape: f32[32,4], index: 6, kind: input, shape index: {}]   ;;  %s2513_s8 = inlined_call_operand.vmem [shape: f32[16,4], index: 8, kind: output, shape index: {1}]  }
   0x1   :  { %v1961_v0 = vld [vmem:[%s2505_s0] sm:$0xff]  ;;  %v1968_v2 = vld [vmem:[%s2505_s0 + $0x8] sm:$0xff]  ;;  %1847 = vrcp.f32 %v1893_v6  ;;  %v786_v18 = vld [vmem:[%s2508_s1 + $0x18] sm:$0xff]  ;;  %s1904_s23 = smov 88   ;;  %s1905_s24 = smov 56  }
   0x2   :  { %v31_v1 = vmul.f32 %v1961_v0, %v1961_v0  ;;  %v32_v4 = vmul.f32 %v1968_v2, %v1968_v2  ;;  %v1824_v12 = vld [vmem:[%s2507_s4 + $0x8] sm:$0xff]  ;;  %v1823_v14 = vld [vmem:[%s2507_s4] sm:$0xff]  ;;  %v785_v19 = vld [vmem:[%s2508_s1 + $0x10] sm:$0xff]  ;;  %807 = vmatpush.msra.mxu1 %v786_v18  ;;  %852 = vmatpush.msra.mxu2 %v786_v18  ;;  %v1993_v27 = vand.u32 127, %v113_v25  ;;  %v1996_v44 = vshrl.u32 %v113_v25, 7  ;;  %s1906_s25 = smov 104  }
   0x3   :  { %105 = vmatpush.bf16.msra.mxu0 %v1824_v12  ;;  %v784_v20 = vld [vmem:[%s2508_s1 + $0x8] sm:$0xff]  ;;  %v1845_v47 = vld [vmem:[%s2506_s2] ss:$0 sm:$0xff]  ;;  %v1895_v12 = vmov 683565275   ;;  %s1907_s26 = smov 64  }
   0x4   :  { %v34_v3 = vsel %vm33_vm0, %v31_v1, 0.0  ;;  %v37_v5 = vsel %vm33_vm0, %v32_v4, 0.0  ;;  %808 = vmatpush.msra.mxu1 %v785_v19  ;;  %853 = vmatpush.msra.mxu2 %v785_v19  ;;  %v148_v29 = vand.u32 7, %v1993_v27  ;;  %v120_v48 = vand.u32 7, %v1996_v44  ;;  %s1908_s27 = smov 80   ;;  %s1909_s28 = smov 112  }
   0x5   :  { %35 = vadd.xlane.f32.xlu0 %v34_v3  ;;  %v115_v58 = vadd.s32 8, %v1996_v44  ;;  %v1897_v18 = vmov 2131351028   ;;  %s1910_s29 = smov 72   ;;  %s1911_s30 = smov 40  }
   0x6   :  { %809 = vmatpush.msra.mxu1 %v784_v20  ;;  %854 = vmatpush.msra.mxu2 %v784_v20  ;;  %v1772_v31 = vadd.s32 4294967292, %v148_v29  ;;  %vm156_vm2 = vcmp.lt.s32.totalorder %v148_v29, 4  ;;  %v140_v51 = vcvt.s32.f32 %v120_v48  ;;  %s1912_s13 = smov 48  }
   0x7   :  { %v1848_v7 = vpop.eup %1847  ;;  %106 = vmatpush.bf16.msra.mxu0 %v1823_v14  ;;  %v127_v60 = vand.u32 7, %v115_v58 }
   0x8   :  { %v41_v8 = vmul.f32 32.0, %v1848_v7  ;;  %vm45_vm1 = vweird.f32 %v1848_v7  ;;  %v158_v34 = vsel %vm156_vm2, %v148_v29, %v1772_v31  ;;  %v1899_v31 = vmov 1326507024  }
   0x9   :  { %v159_v36 = vcvt.s32.f32 %v158_v34  ;;  %v141_v62 = vcvt.s32.f32 %v127_v60 }
   0xa   :  { %v42_v9 = vsub.f32 1.0, %v41_v8  ;;  %v1894_v8 = vmov 2102212464  }
   0xb   :  { %v160_v39 = vmul.f32 -2.3025851, %v159_v36 }
   0xc   :  { %v43_v10 = vmul.f32 %v1848_v7, %v42_v9 }
   0xd   :  { %38 = vadd.xlane.f32.xlu0 %v37_v5  ;;  %v161_v41 = vmul.f32 1.442695, %v160_v39 }
   0xe   :  { %v44_v11 = vadd.f32 %v1848_v7, %v43_v10 }
  0x10   :  { %v1977_v13 = vsel %vm45_vm1, %v1848_v7, %v44_v11 }
  0x78   :  { %v36_v15 = vpop.xlane.xlu0 %35 }
  0x79   :  { %v47_v16 = vmul.f32 %v1977_v13, %v36_v15  ;;  %v1896_v15 = vmov 2475754826  }
  0x7b   :  { %v49_v17 = vadd.f32 1e-05, %v47_v16 }
  0x7d   :  { %1849 = vrsqrt.f32 %v49_v17  ;;  %vm57_vm4 = vweird.f32 %v49_v17 }
  0x80   :  { %v39_v21 = vpop.xlane.xlu0 %38 }
  0x81   :  { %v48_v22 = vmul.f32 %v1977_v13, %v39_v21 }
  0x83   :  { %v1850_v23 = vpop.eup %1849  ;;  %v50_v24 = vadd.f32 1e-05, %v48_v22 }
  0x84   :  { %v52_v26 = vmul.f32 %v1850_v23, %v49_v17  ;;  %vm58_vm3 = vweird.f32 %v1850_v23 }
  0x85   :  { %1851 = vrsqrt.f32 %v50_v24  ;;  %vm59_vm5 = vmor %vm57_vm4, %vm58_vm3  ;;  %vm67_vm7 = vweird.f32 %v50_v24 }
  0x86   :  { %v53_v28 = vmul.f32 %v1850_v23, %v52_v26  ;;  %1853 = vpow2.f32 %v161_v41 }
  0x88   :  { %v54_v30 = vmul.f32 0.5, %v53_v28 }
  0x8a   :  { %v55_v32 = vsub.f32 1.5, %v54_v30 }
  0x8b   :  { %v1852_v33 = vpop.eup %1851 }
  0x8c   :  { %v62_v35 = vmul.f32 %v1852_v33, %v50_v24  ;;  %v56_v37 = vmul.f32 %v1850_v23, %v55_v32  ;;  %vm68_vm6 = vweird.f32 %v1852_v33  ;;  %v1854_v52 = vpop.eup %1853  ;;  %v1898_v24 = vmov 920167782  }
  0x8d   :  { %vm69_vm8 = vmor %vm67_vm7, %vm68_vm6  ;;  %v2004_v55 = vmul.f32 %v1854_v52, %v140_v51 }
  0x8e   :  { %v63_v38 = vmul.f32 %v1852_v33, %v62_v35  ;;  %v60_v42 = vsel %vm59_vm5, %v1850_v23, %v56_v37 }
  0x8f   :  { %v71_v46 = vmul.f32 %v60_v42, %v1961_v0  ;;  %v168_v57 = vand.u32 2139095040, %v2004_v55  ;;  %v2009_v0 = vmul.f32 %v1854_v52, %v141_v62  ;;  %v165_v7 = vand.u32 2147483647, %v2004_v55 }
  0x90   :  { %v64_v40 = vmul.f32 0.5, %v63_v38 }
  0x91   :  { %v77_v53 = vmul.f32 %v1845_v47, %v71_v46  ;;  %v169_v59 = vshrl.u32 %v168_v57, 23  ;;  %v322_v1 = vand.u32 2139095040, %v2009_v0  ;;  %v172_v10 = vand.u32 8388607, %v165_v7 }
  0x92   :  { %v65_v43 = vsub.f32 1.5, %v64_v40  ;;  %v319_v37 = vand.u32 2147483647, %v2009_v0 }
  0x93   :  { %v1773_v61 = vadd.s32 4294967169, %v169_v59  ;;  %v323_v4 = vshrl.u32 %v322_v1, 23  ;;  %v173_v22 = vor.u32 8388608, %v172_v10 }
  0x94   :  { %v66_v45 = vmul.f32 %v1852_v33, %v65_v43 }
  0x95   :  { %v175_v63 = vadd.s32 1, %v1773_v61  ;;  %v1776_v6 = vadd.s32 4294967169, %v323_v4  ;;  %v2048_v34 = vshll.u32 %v173_v22, 8 }
  0x96   :  { %v70_v49 = vsel %vm69_vm8, %v1852_v33, %v66_v45 }
  0x97   :  { %v72_v50 = vmul.f32 %v70_v49, %v1968_v2  ;;  %vm176_vm9 = vcmp.gt.s32.totalorder %v175_v63, 0  ;;  %v329_v38 = vadd.s32 1, %v1776_v6  ;;  %v214_v41 = vand.u32 65535, %v2048_v34 }
  0x98   :  { %v177_v2 = vsel %vm176_vm9, %v175_v63, 0  ;;  %v215_v45 = vshrl.u32 %v2048_v34, 16 }
  0x99   :  { %v78_v54 = vmul.f32 %v1845_v47, %v72_v50  ;;  %v179_v3 = vand.u32 31, %v177_v2  ;;  %v2018_v11 = vshrl.u32 %v177_v2, 5  ;;  %vm330_vm14 = vcmp.gt.s32.totalorder %v329_v38, 0 }
  0x9a   :  { %v2072_v50 = vand.u32 8388607, %v319_v37 }
  0x9b   :  { %v79_v56 = vpack.c.bf16 %v78_v54, %v77_v53  ;;  %v2012_v5 = vsub.s32 32, %v179_v3  ;;  %v191_v9 = vshll.u32 %v1894_v8, %v179_v3  ;;  %v182_v14 = vshll.u32 %v1895_v12, %v179_v3 }
  0x9c   :  { %v185_v17 = vshll.u32 %v1896_v15, %v179_v3  ;;  %v188_v20 = vshll.u32 %v1897_v18, %v179_v3  ;;  %v194_v26 = vshll.u32 %v1898_v24, %v179_v3  ;;  %vm197_vm10 = vcmp.lt.s32.totalorder %v2018_v11, 1 }
  0x9d   :  { %1771 = vmatmul.msk.bf16.vlgmr.msra.gmra.mxu0 %vm33_vm0, %v79_v56  ;;  %v183_v16 = vshrl.u32 %v1896_v15, %v2012_v5  ;;  %v186_v19 = vshrl.u32 %v1897_v18, %v2012_v5  ;;  %v189_v21 = vshrl.u32 %v1894_v8, %v2012_v5  ;;  %v192_v25 = vshrl.u32 %v1898_v24, %v2012_v5 }
  0x9e   :  { %v195_v32 = vshrl.u32 %v1899_v31, %v2012_v5  ;;  %vm199_vm11 = vcmp.lt.s32.totalorder %v2018_v11, 3  ;;  %vm198_vm12 = vcmp.lt.s32.totalorder %v2018_v11, 2  ;;  %vm200_vm13 = vcmp.lt.s32.totalorder %v2018_v11, 4 }
  0x9f   :  { %v2029_v23 = vor.u32 %v183_v16, %v182_v14  ;;  %v2034_v28 = vor.u32 %v186_v19, %v185_v17  ;;  %v2036_v29 = vor.u32 %v189_v21, %v188_v20  ;;  %v193_v30 = vor.u32 %v192_v25, %v191_v9 }
  0xa0   :  { %v196_v35 = vor.u32 %v195_v32, %v194_v26  ;;  %v331_v54 = vsel %vm330_vm14, %v329_v38, 0  ;;  %v327_v9 = vor.u32 8388608, %v2072_v50  ;;  %v1900_v20 = vmov 0  }
  0xa1   :  { %v205_v33 = vsel %vm197_vm10, %v2029_v23, %v2034_v28  ;;  %v206_v36 = vsel %vm200_vm13, %v193_v30, 920167782  ;;  %v209_v40 = vsel %vm197_vm10, %v2034_v28, %v2036_v29  ;;  %v2074_v58 = vshrl.u32 %v331_v54, 5 }
  0xa2   :  { %v207_v39 = vsel %vm199_vm11, %v2036_v29, %v206_v36  ;;  %v210_v43 = vsel %vm200_vm13, %v196_v35, 1326507024  ;;  %v333_v2 = vand.u32 31, %v331_v54  ;;  %v202_v35 = vsel %vm200_vm13, %v2036_v29, 2102212464 }
  0xa3   :  { %v208_v42 = vsel %vm198_vm12, %v205_v33, %v207_v39  ;;  %v211_v46 = vsel %vm199_vm11, %v193_v30, %v210_v43  ;;  %vm351_vm1 = vcmp.lt.s32.totalorder %v2074_v58, 1  ;;  %v181_v30 = vshrl.u32 %v1895_v12, %v2012_v5 }
  0xa4   :  { %v238_v47 = vand.u32 65535, %v208_v42  ;;  %v239_v48 = vshrl.u32 %v208_v42, 16  ;;  %v212_v49 = vsel %vm198_vm12, %v209_v40, %v211_v46  ;;  %v334_v16 = vsub.s32 32, %v333_v2 }
  0xa5   :  { %v216_v51 = vand.u32 65535, %v212_v49  ;;  %v217_v52 = vshrl.u32 %v212_v49, 16  ;;  %vm353_vm5 = vcmp.lt.s32.totalorder %v2074_v58, 3  ;;  %v336_v39 = vshll.u32 %v1895_v12, %v333_v2 }
  0xa6   :  { %v241_v53 = vmul.u32 %v239_v48, %v214_v41  ;;  %v240_v56 = vmul.u32 %v238_v47, %v214_v41  ;;  %v242_v57 = vmul.u32 %v238_v47, %v215_v45  ;;  %v243_v62 = vmul.u32 %v239_v48, %v215_v45 }
  0xa7   :  { %v218_v59 = vmul.u32 %v216_v51, %v214_v41  ;;  %v219_v60 = vmul.u32 %v217_v52, %v214_v41  ;;  %v220_v61 = vmul.u32 %v216_v51, %v215_v45  ;;  %v221_v3 = vmul.u32 %v217_v52, %v215_v45 }
  0xa8   :  { %v244_v63 = vshll.u32 %v241_v53, 16  ;;  %v246_v1 = vshll.u32 %v242_v57, 16  ;;  %v245_v10 = vshrl.u32 %v241_v53, 16  ;;  %v247_v25 = vshrl.u32 %v242_v57, 16 }
  0xa9   :  { %v222_v4 = vshll.u32 %v219_v60, 16  ;;  %v224_v6 = vshll.u32 %v220_v61, 16  ;;  %v223_v17 = vshrl.u32 %v219_v60, 16  ;;  %v225_v32 = vshrl.u32 %v220_v61, 16 }
  0xaa   :  { %vm248_vm15 = vc.u32 %v240_v56, %v244_v63  ;;  %v250_v14 = vadd.s32 %v244_v63, %v240_v56  ;;  %vm352_vm6 = vcmp.lt.s32.totalorder %v2074_v58, 2  ;;  %v201_v5 = vsel %vm197_vm10, %v181_v30, %v2029_v23 }
  0xab   :  { %vm226_vm2 = vc.u32 %v218_v59, %v222_v4  ;;  %v228_v19 = vadd.s32 %v222_v4, %v218_v59  ;;  %v249_v21 = vsel %vm248_vm15, 1, %v1900_v20  ;;  %v203_v40 = vsel %vm199_vm11, %v2034_v28, %v202_v35 }
  0xac   :  { %v227_v22 = vsel %vm226_vm2, 1, %v1900_v20  ;;  %v251_v26 = vadd.s32 %v249_v21, %v243_v62  ;;  %vm252_vm3 = vc.u32 %v250_v14, %v246_v1  ;;  %v2096_v42 = vadd.s32 %v250_v14, %v246_v1 }
  0xad   :  { %v229_v33 = vadd.s32 %v227_v22, %v221_v3  ;;  %vm230_vm4 = vc.u32 %v228_v19, %v224_v6  ;;  %v253_v38 = vsel %vm252_vm3, 1, %v1900_v20  ;;  %v204_v29 = vsel %vm198_vm12, %v201_v5, %v203_v40 }
  0xae   :  { %v231_v36 = vsel %vm230_vm4, 1, %v1900_v20  ;;  %v255_v43 = vadd.s32 %v253_v38, %v251_v26  ;;  %v337_v45 = vshrl.u32 %v1896_v15, %v334_v16  ;;  %v339_v46 = vshll.u32 %v1896_v15, %v333_v2 }
  0xaf   :  { %v233_v41 = vadd.s32 %v231_v36, %v229_v33  ;;  %v258_v48 = vmul.u32 %v2048_v34, %v204_v29  ;;  %v340_v23 = vshrl.u32 %v1897_v18, %v334_v16  ;;  %v342_v49 = vshll.u32 %v1897_v18, %v333_v2 }
  0xb0   :  { %v256_v50 = vadd.s32 %v255_v43, %v245_v10  ;;  %v338_v28 = vor.u32 %v337_v45, %v336_v39  ;;  %v343_v51 = vshrl.u32 %v1894_v8, %v334_v16  ;;  %v345_v52 = vshll.u32 %v1894_v8, %v333_v2 }
  0xb1   :  { %v234_v47 = vadd.s32 %v233_v41, %v223_v17  ;;  %v341_v53 = vor.u32 %v340_v23, %v339_v46  ;;  %v346_v54 = vshrl.u32 %v1898_v24, %v334_v16  ;;  %v348_v15 = vshll.u32 %v1898_v24, %v333_v2 }
  0xb2   :  { %v257_v56 = vadd.s32 %v256_v50, %v247_v25  ;;  %v344_v57 = vor.u32 %v343_v51, %v342_v49  ;;  %v349_v34 = vshrl.u32 %v1899_v31, %v334_v16  ;;  %vm354_vm7 = vcmp.lt.s32.totalorder %v2074_v58, 4 }
  0xb3   :  { %v2107_v11 = vadd.s32 %v234_v47, %v225_v32  ;;  %v335_v18 = vshrl.u32 %v1895_v12, %v334_v16  ;;  %v347_v59 = vor.u32 %v346_v54, %v345_v52  ;;  %v359_v8 = vsel %vm351_vm1, %v338_v28, %v341_v53 }
  0xb4   :  { %v261_v60 = vadd.s32 1, %v257_v56  ;;  %v350_v61 = vor.u32 %v349_v34, %v348_v15  ;;  %v356_v24 = vsel %vm354_vm7, %v344_v57, 2102212464  ;;  %v363_v62 = vsel %vm351_vm1, %v341_v53, %v344_v57 }
  0xb5   :  { %vm260_vm8 = vc.u32 %v2107_v11, %v2096_v42  ;;  %v355_v31 = vsel %vm351_vm1, %v335_v18, %v338_v28  ;;  %v357_v63 = vsel %vm353_vm5, %v341_v53, %v356_v24  ;;  %v360_v12 = vsel %vm354_vm7, %v347_v59, 920167782 }
  0xb6   :  { %v2128_v1 = vshll.u32 %v327_v9, 8  ;;  %v262_v2 = vsel %vm260_vm8, %v261_v60, %v257_v56  ;;  %v2132_v3 = vsel %vm352_vm6, %v355_v31, %v357_v63  ;;  %v361_v4 = vsel %vm353_vm5, %v344_v57, %v360_v12 }
  0xb7   :  { %v364_v6 = vsel %vm354_vm7, %v350_v61, 1326507024  ;;  %v263_v10 = vadd.s32 %v262_v2, %v258_v48  ;;  %v362_v14 = vsel %vm352_vm6, %v359_v8, %v361_v4  ;;  %v259_v2 = vadd.s32 %v2096_v42, %v2107_v11 }
  0xb8   :  { %v365_v16 = vsel %vm353_vm5, %v347_v59, %v364_v6  ;;  %v368_v9 = vand.u32 65535, %v2128_v1  ;;  %v369_v19 = vshrl.u32 %v2128_v1, 16  ;;  %v392_v21 = vand.u32 65535, %v362_v14 }
  0xb9   :  { %v366_v17 = vsel %vm352_vm6, %v363_v62, %v365_v16  ;;  %v393_v22 = vshrl.u32 %v362_v14, 16  ;;  %v264_v25 = vadd.s32 536870912, %v263_v10  ;;  %v412_v4 = vmul.u32 %v2128_v1, %v2132_v3 }
  0xba   :  { %v370_v26 = vand.u32 65535, %v366_v17  ;;  %v371_v30 = vshrl.u32 %v366_v17, 16  ;;  %v394_v32 = vmul.u32 %v392_v21, %v368_v9  ;;  %v396_v35 = vmul.u32 %v392_v21, %v369_v19 }
  0xbb   :  { %v395_v33 = vmul.u32 %v393_v22, %v368_v9  ;;  %v2146_v36 = vshrl.u32 %v264_v25, 30  ;;  %v397_v40 = vmul.u32 %v393_v22, %v369_v19  ;;  %vm167_vm2 = vcmp.lt.s32.totalorder %v2004_v55, 0 }
  0xbc   :  { %v372_v38 = vmul.u32 %v370_v26, %v368_v9  ;;  %v373_v39 = vmul.u32 %v371_v30, %v368_v9  ;;  %v374_v5 = vmul.u32 %v370_v26, %v369_v19  ;;  %v400_v29 = vshll.u32 %v396_v35, 16 }
  0xbd   :  { %v398_v41 = vshll.u32 %v395_v33, 16  ;;  %v266_v58 = vshll.u32 %v2146_v36, 30  ;;  %v375_v43 = vmul.u32 %v371_v30, %v369_v19  ;;  %v399_v47 = vshrl.u32 %v395_v33, 16 }
  0xbe   :  { %v376_v45 = vshll.u32 %v373_v39, 16  ;;  %v378_v46 = vshll.u32 %v374_v5, 16  ;;  %v377_v28 = vshrl.u32 %v373_v39, 16  ;;  %v379_v15 = vshrl.u32 %v374_v5, 16 }
  0xbf   :  { %vm402_vm9 = vc.u32 %v394_v32, %v398_v41  ;;  %v404_v48 = vadd.s32 %v398_v41, %v394_v32  ;;  %v267_v23 = vsub.s32 %v263_v10, %v266_v58  ;;  %v401_v59 = vshrl.u32 %v396_v35, 16 }
  0xc0   :  { %vm380_vm10 = vc.u32 %v372_v38, %v376_v45  ;;  %v382_v49 = vadd.s32 %v376_v45, %v372_v38  ;;  %v403_v50 = vsel %vm402_vm9, 1, %v1900_v20  ;;  %vm2163_vm4 = vcmp.le.f32.partialorder %v165_v7, 0.7853982  ;;  %v783_v7 = vld [vmem:[%s2508_s1] sm:$0xff]  ;;  %s1901_s1 = smov 96  }
  0xc1   :  { %v381_v51 = vsel %vm380_vm10, 1, %v1900_v20  ;;  %v405_v52 = vadd.s32 %v403_v50, %v397_v40  ;;  %vm406_vm11 = vc.u32 %v404_v48, %v400_v29  ;;  %vm268_vm12 = vcmp.lt.s32.totalorder %v267_v23, 0  ;;  %810 = vmatpush.msra.mxu1 %v783_v7  ;;  %855 = vmatpush.msra.mxu2 %v783_v7 }
  0xc2   :  { %v269_v53 = vsub.s32 0, %v267_v23  ;;  %v383_v54 = vadd.s32 %v381_v51, %v375_v43  ;;  %vm384_vm13 = vc.u32 %v382_v49, %v378_v46  ;;  %v407_v57 = vsel %vm406_vm11, 1, %v1900_v20 }
  0xc3   :  { %v385_v56 = vsel %vm384_vm13, 1, %v1900_v20  ;;  %v409_v8 = vadd.s32 %v407_v57, %v405_v52  ;;  %v408_v24 = vadd.s32 %v404_v48, %v400_v29  ;;  %vm308_vm8 = vweird.f32 %v2004_v55 }
  0xc4   :  { %v270_v34 = vsel %vm268_vm12, %v269_v53, %v267_v23  ;;  %v387_v18 = vadd.s32 %v385_v56, %v383_v54  ;;  %vm879_vm12 = vcmask 64512   ;;  %vm939_vm13 = vcmask 1043456  }
  0xc5   :  { %v271_v60 = vclz %v270_v34  ;;  %v410_v62 = vadd.s32 %v409_v8, %v399_v47 }
  0xc6   :  { %v388_v61 = vadd.s32 %v387_v18, %v377_v28 }
  0xc7   :  { %v1774_v31 = vadd.s32 4294967294, %v271_v60  ;;  %v411_v12 = vadd.s32 %v410_v62, %v401_v59 }
  0xc8   :  { %v389_v63 = vadd.s32 %v388_v61, %v379_v15  ;;  %v289_v61 = vsub.s32 4, %v2146_v36 }
  0xc9   :  { %vm1775_vm14 = vcmp.lt.s32.totalorder %v1774_v31, 0  ;;  %v415_v20 = vadd.s32 1, %v411_v12 }
  0xca   :  { %v274_v6 = vsel %vm1775_vm14, 0, %v1774_v31  ;;  %vm414_vm15 = vc.u32 %v389_v63, %v408_v24  ;;  %v413_v25 = vadd.s32 %v408_v24, %v389_v63  ;;  %v290_v31 = vsel %vm167_vm2, %v289_v61, %v2146_v36 }
  0xcb   :  { %v275_v10 = vsub.s32 32, %v274_v6  ;;  %v279_v14 = vsub.s32 4294967266, %v274_v6  ;;  %v416_v16 = vsel %vm414_vm15, %v415_v20, %v411_v12  ;;  %v276_v9 = vshll.u32 %v267_v23, %v274_v6 }
  0xcc   :  { %v417_v21 = vadd.s32 %v416_v16, %v412_v4  ;;  %vm2224_vm14 = vcmp.le.s32.totalorder %v1993_v27, %v1996_v44  ;;  %vm321_vm15 = vcmp.lt.s32.totalorder %v2009_v0, 0 }
  0xcd   :  { %v277_v17 = vshrl.u32 %v259_v2, %v275_v10  ;;  %v280_v19 = vadd.s32 127, %v279_v14  ;;  %v292_v2 = vsel %vm2163_vm4, 0, %v290_v31 }
  0xce   :  { %v418_v26 = vadd.s32 536870912, %v417_v21  ;;  %v309_v20 = vand.u32 3, %v292_v2 }
  0xcf   :  { %v281_v22 = vshll.u32 %v280_v19, 23  ;;  %v278_v30 = vor.u32 %v277_v17, %v276_v9 }
  0xd0   :  { %v2157_v42 = vshrl.u32 %v418_v26, 30  ;;  %vm311_vm5 = vcmp.eq.s32.totalorder %v309_v20, 0  ;;  %vm314_vm6 = vcmp.eq.s32.totalorder %v309_v20, 2  ;;  %vm310_vm7 = vcmp.lt.s32.totalorder %v309_v20, 2 }
  0xd1   :  { %v282_v32 = vor.u32 4788187, %v281_v22  ;;  %v285_v3 = vcvt.s32.f32 %v278_v30  ;;  %v617_v22 = vadd.s32 3, %v292_v2 }
  0xd2   :  { %v420_v11 = vshll.u32 %v2157_v42, 30  ;;  %v443_v31 = vsub.s32 4, %v2157_v42 }
  0xd3   :  { %v283_v1 = vand.u32 2147483647, %v282_v32 }
  0xd4   :  { %v421_v33 = vsub.s32 %v417_v21, %v420_v11  ;;  %v444_v2 = vsel %vm321_vm15, %v443_v31, %v2157_v42 }
  0xd5   :  { %v286_v38 = vmul.f32 %v285_v3, %v283_v1 }
  0xd6   :  { %vm422_vm1 = vcmp.lt.s32.totalorder %v421_v33, 0  ;;  %v423_v35 = vsub.s32 0, %v421_v33 }
  0xd7   :  { %v287_v41 = vxor.u32 2147483648, %v286_v38 }
  0xd8   :  { %v424_v39 = vsel %vm422_vm1, %v423_v35, %v421_v33  ;;  %vm2235_vm1 = vcmp.le.f32.partialorder %v319_v37, 0.7853982 }
  0xd9   :  { %v425_v5 = vclz %v424_v39  ;;  %v288_v47 = vsel %vm167_vm2, %v287_v41, %v286_v38  ;;  %v2258_v20 = vsel %vm2235_vm1, 0, %v444_v2 }
  0xda   :  { %v291_v49 = vsel %vm2163_vm4, %v2004_v55, %v288_v47 }
  0xdb   :  { %v1777_v40 = vadd.s32 4294967294, %v425_v5  ;;  %v293_v53 = vmul.f32 %v291_v49, %v291_v49 }
  0xdd   :  { %vm1778_vm3 = vcmp.lt.s32.totalorder %v1777_v40, 0  ;;  %v301_v56 = vmul.f32 -0.00019511016, %v293_v53  ;;  %v294_v57 = vmul.f32 -0.001358992, %v293_v53 }
  0xde   :  { %v428_v29 = vsel %vm1778_vm3, 0, %v1777_v40 }
  0xdf   :  { %v429_v58 = vsub.s32 32, %v428_v29  ;;  %v430_v43 = vshll.u32 %v421_v33, %v428_v29  ;;  %v433_v45 = vsub.s32 4294967266, %v428_v29  ;;  %v302_v34 = vadd.f32 0.008332121, %v301_v56 }
  0xe0   :  { %v295_v18 = vadd.f32 0.041655596, %v294_v57 }
  0xe1   :  { %v431_v48 = vshrl.u32 %v413_v25, %v429_v58  ;;  %v434_v23 = vadd.s32 127, %v433_v45  ;;  %v303_v59 = vmul.f32 %v302_v34, %v293_v53  ;;  %v618_v25 = vand.u32 3, %v617_v22 }
  0xe2   :  { %v296_v8 = vmul.f32 %v295_v18, %v293_v53 }
  0xe3   :  { %v432_v50 = vor.u32 %v431_v48, %v430_v43  ;;  %v435_v28 = vshll.u32 %v434_v23, 23  ;;  %v304_v60 = vadd.f32 -0.16666654, %v303_v59  ;;  %vm620_vm9 = vcmp.eq.s32.totalorder %v618_v25, 0 }
  0xe4   :  { %v297_v24 = vadd.f32 -0.4999988, %v296_v8  ;;  %vm623_vm10 = vcmp.eq.s32.totalorder %v618_v25, 2  ;;  %vm619_vm11 = vcmp.lt.s32.totalorder %v618_v25, 2 }
  0xe5   :  { %v436_v51 = vor.u32 4788187, %v435_v28  ;;  %v439_v52 = vcvt.s32.f32 %v432_v50  ;;  %v305_v62 = vmul.f32 %v304_v60, %v293_v53 }
  0xe6   :  { %v298_v63 = vmul.f32 %v297_v24, %v293_v53 }
  0xe7   :  { %v437_v54 = vand.u32 2147483647, %v436_v51  ;;  %v306_v12 = vadd.f32 1.0, %v305_v62 }
  0xe8   :  { %v299_v4 = vadd.f32 1.0, %v298_v63 }
  0xe9   :  { %v2175_v15 = vmul.f32 %v439_v52, %v437_v54  ;;  %v307_v6 = vmul.f32 %v306_v12, %v291_v49 }
  0xea   :  { %v315_v14 = vxor.u32 2147483648, %v299_v4 }
  0xeb   :  { %v312_v10 = vxor.u32 2147483648, %v307_v6  ;;  %v441_v7 = vxor.u32 2147483648, %v2175_v15 }
  0xec   :  { %v316_v9 = vsel %vm314_vm6, %v315_v14, %v307_v6  ;;  %v625_v32 = vsel %vm623_vm10, %v315_v14, %v307_v6 }
  0xed   :  { %v313_v36 = vsel %vm311_vm5, %v299_v4, %v312_v10  ;;  %v622_v30 = vsel %vm620_vm9, %v299_v4, %v312_v10  ;;  %v442_v27 = vsel %vm321_vm15, %v441_v7, %v2175_v15  ;;  %vm462_vm5 = vweird.f32 %v2009_v0 }
  0xee   :  { %v317_v17 = vsel %vm310_vm7, %v313_v36, %v316_v9  ;;  %v626_v11 = vsel %vm619_vm11, %v622_v30, %v625_v32  ;;  %v445_v44 = vsel %vm2235_vm1, %v2009_v0, %v442_v27 }
  0xef   :  { %v318_v21 = vsel %vm308_vm8, nan, %v317_v17  ;;  %v627_v1 = vsel %vm308_vm8, nan, %v626_v11  ;;  %v447_v56 = vmul.f32 %v445_v44, %v445_v44 }
  0xf1   :  { %v455_v57 = vmul.f32 -0.00019511016, %v447_v56  ;;  %v448_v34 = vmul.f32 -0.001358992, %v447_v56 }
  0xf3   :  { %v456_v18 = vadd.f32 0.008332121, %v455_v57  ;;  %v449_v37 = vadd.f32 0.041655596, %v448_v34  ;;  %v957_v57 = vld [vmem:[%s2509_s5] sm:$0xf] }
  0xf4   :  { %v1059_v34 = vsel %vm939_vm13, %v957_v57, 0 }
  0xf5   :  { %v457_v8 = vmul.f32 %v456_v18, %v447_v56  ;;  %v450_v24 = vmul.f32 %v449_v37, %v447_v56 }
  0xf7   :  { %v458_v62 = vadd.f32 -0.16666654, %v457_v8  ;;  %v451_v63 = vadd.f32 -0.4999988, %v450_v24 }
  0xf9   :  { %v459_v12 = vmul.f32 %v458_v62, %v447_v56  ;;  %v452_v4 = vmul.f32 %v451_v63, %v447_v56 }
  0xfb   :  { %v460_v6 = vadd.f32 1.0, %v459_v12  ;;  %v2262_v10 = vadd.f32 1.0, %v452_v4 }
  0xfd   :  { %v2264_v14 = vmul.f32 %v460_v6, %v445_v44  ;;  %v469_v42 = vxor.u32 2147483648, %v2262_v10 }
  0xff   :  { %v466_v36 = vxor.u32 2147483648, %v2264_v14 }
 0x11a   :  { %v108_v16 = vpop.f32.mrf.mxu0 }
 0x11b   :  { %832 = vrot.lane.b32.xlu1 %v108_v16, %s1901_s1  ;;  %1785 = vmatmul.msk.f32.vlgmr.msra.gmra.mxu1 %vm33_vm0, %v108_v16  ;;  %v787_v33 = vmul.f32 %v318_v21, %v108_v16  ;;  %v2207_v55 = vpack.c.bf16 %v108_v16, %v108_v16 }
 0x122   :  { %v2186_v19 = vpop.f32.mrf.mxu0 }
 0x123   :  { %824 = vrot.lane.b32.xlu1 %v318_v21, %s1902_s21  ;;  %1786 = vmatmul.msk.f32.gmra.mxu1 %vm33_vm0, %v2186_v19 }
 0x18d   :  { %v833_v26 = vpop.permute.xlu1 %832 }
 0x18e   :  { %1787 = vmatmul.msk.f32.vlgmr.msra.gmra.mxu2 %vm33_vm0, %v833_v26 }
 0x195   :  { %v825_v40 = vpop.permute.xlu1 %824 }
 0x196   :  { %v830_v41 = vmul.f32 %v825_v40, %v108_v16  ;;  %v463_v16 = vand.u32 3, %v2258_v20 }
 0x198   :  { %v812_v3 = vpop.f32.mrf.mxu1  ;;  %vm465_vm2 = vcmp.eq.s32.totalorder %v463_v16, 0  ;;  %vm468_vm3 = vcmp.eq.s32.totalorder %v463_v16, 2  ;;  %vm464_vm4 = vcmp.lt.s32.totalorder %v463_v16, 2 }
 0x199   :  { %v818_v35 = vmul.f32 %v812_v3, %v627_v1  ;;  %v467_v9 = vsel %vm465_vm2, %v2262_v10, %v466_v36  ;;  %v470_v17 = vsel %vm468_vm3, %v469_v42, %v2264_v14 }
 0x19a   :  { %v471_v21 = vsel %vm464_vm4, %v467_v9, %v470_v17 }
 0x19b   :  { %v2196_v38 = vadd.f32 %v818_v35, %v787_v33  ;;  %v2280_v22 = vsel %vm462_vm5, nan, %v471_v21 }
 0x19d   :  { %958 = vrot.lane.b32.xlu0 %v2196_v38, %s1903_s22 }
 0x1a0   :  { %v2220_v49 = vpop.f32.mrf.mxu1 }
 0x20f   :  { %v959_v45 = vpop.permute.xlu0 %958 }
 0x211   :  { %v857_v39 = vpop.f32.mrf.mxu2 }
 0x212   :  { %v863_v5 = vmul.f32 %v857_v39, %v627_v1 }
 0x214   :  { %867 = vrot.lane.b32.xlu2 %v863_v5, %s1902_s21 }
 0x26e   :  { %v868_v29 = vpop.permute.xlu2 %867 }
 0x26f   :  { %v2201_v58 = vadd.f32 %v868_v29, %v830_v41 }
 0x271   :  { %960 = vrot.lane.b32.xlu2 %v2201_v58, %s1904_s23  ;;  %877 = vrot.lane.b32.xlu0 %v2201_v58, %s1901_s1 }
 0x279   :  { %1013 = vrot.lane.b32.xlu0 %v2207_v55, %s1905_s24 }
 0x281   :  { %834 = vrot.lane.b32.xlu0 %v2186_v19, %s1901_s1 }
 0x2cb   :  { %v961_v43 = vpop.permute.xlu2 %960 }
 0x2cc   :  { %1792 = vmatpush.xpose.msk.msrb.mxu1 %vm879_vm12, %v961_v43 }
 0x2cf   :  { %1793 = vmatmul.msk.f32.vlgmr.msrb.gmra.mxu1 %vm879_vm12, %v959_v45 }
 0x2e3   :  { %v878_v46 = vpop.permute.xlu0 %877 }
 0x2e4   :  { %1789 = vmatpush.xpose.msk.msra.mxu3 %vm879_vm12, %v878_v46 }
 0x2e7   :  { %1790 = vmatmul.msk.f32.vlgmr.msra.gmra.mxu3 %vm879_vm12, %v2196_v38 }
 0x2eb   :  { %v1014_v47 = vpop.permute.xlu0 %1013 }
 0x2ec   :  { %v1019_v48 = vsel %vm939_vm13, %v1014_v47, 0 }
 0x2ed   :  { %1028 = vmatpush.bf16.msra.mxu1 %v1019_v48 }
 0x2f3   :  { %v835_v23 = vpop.permute.xlu0 %834 }
 0x2f4   :  { %1788 = vmatmul.msk.f32.gmra.mxu2 %vm33_vm0, %v835_v23 }
 0x34c   :  { %v983_v50 = vpop.f32.mrf.mxu1 }
 0x34d   :  { %v986_v51 = vmul.f32 0.35355338, %v983_v50 }
 0x34f   :  { %v987_v52 = vsel %vm2224_vm14, %v986_v51, -3.4028235e+38 }
 0x350   :  { %v988_v53 = vsel %vm879_vm12, %v987_v52, -inf }
 0x351   :  { %989 = vmax.xlane.f32.xlu1 %v988_v53 }
 0x36a   :  { %v902_v59 = vpop.f32.mrf.mxu3  ;;  %1172 = vrot.lane.b32.xlu1 %v2196_v38, %s1906_s25 }
 0x36b   :  { %v905_v60 = vmul.f32 0.35355338, %v902_v59 }
 0x36d   :  { %v906_v61 = vsel %vm2224_vm14, %v905_v60, -3.4028235e+38 }
 0x36e   :  { %v907_v15 = vsel %vm879_vm12, %v906_v61, -inf }
 0x36f   :  { %908 = vmax.xlane.f32.xlu0 %v907_v15 }
 0x372   :  { %934 = vrot.lane.b32.xlu1 %v2207_v55, %s1907_s26 }
 0x37a   :  { %1076 = vrot.lane.b32.xlu1 %v2201_v58, %s1908_s27 }
 0x382   :  { %1074 = vrot.lane.b32.xlu1 %v2196_v38, %s1909_s28 }
 0x38a   :  { %826 = vrot.lane.b32.xlu1 %v2280_v22, %s1902_s21 }
 0x3c4   :  { %v990_v25 = vpop.xlane.xlu1 %989 }
 0x3c5   :  { %v991_v26 = vsub.f32 %v987_v52, %v990_v25 }
 0x3c7   :  { %v992_v30 = vmul.f32 1.442695, %v991_v26 }
 0x3c9   :  { %1855 = vpow2.f32 %v992_v30  ;;  %v860_v30 = vpop.f32.mrf.mxu2 }
 0x3cf   :  { %v1856_v32 = vpop.eup %1855 }
 0x3d0   :  { %v994_v11 = vsel %vm879_vm12, %v1856_v32, 0.0 }
 0x3d1   :  { %995 = vadd.xlane.f32.xlu2 %v994_v11 }
 0x3dc   :  { %v2285_v1 = vpop.permute.xlu1 %1172 }
 0x3e2   :  { %v909_v39 = vpop.xlane.xlu0 %908 }
 0x3e3   :  { %v910_v5 = vsub.f32 %v906_v61, %v909_v39  ;;  %v772_v39 = vadd.s32 3, %v2258_v20 }
 0x3e4   :  { %v935_v3 = vpop.permute.xlu1 %934 }
 0x3e5   :  { %v941_v33 = vsel %vm939_vm13, %v935_v3, 0  ;;  %v911_v40 = vmul.f32 1.442695, %v910_v5  ;;  %v773_v5 = vand.u32 3, %v772_v39 }
 0x3e6   :  { %950 = vmatpush.bf16.msrb.mxu3 %v941_v33 }
 0x3e7   :  { %1857 = vpow2.f32 %v911_v40  ;;  %vm775_vm2 = vcmp.eq.s32.totalorder %v773_v5, 0  ;;  %vm778_vm3 = vcmp.eq.s32.totalorder %v773_v5, 2  ;;  %vm774_vm4 = vcmp.lt.s32.totalorder %v773_v5, 2 }
 0x3e8   :  { %v780_v40 = vsel %vm778_vm3, %v469_v42, %v2264_v14 }
 0x3e9   :  { %1174 = vrot.lane.b32.xlu2 %v2201_v58, %s1910_s29  ;;  %v1035_v58 = vld [vmem:[%s2509_s5 + $0x4] sm:$0xf] }
 0x3ea   :  { %v1040_v43 = vsel %vm939_vm13, %v1035_v58, 0  ;;  %1068 = vmatpush.bf16.msra.mxu3 %v1059_v34 }
 0x3eb   :  { %1049 = vmatpush.bf16.msrb.mxu2 %v1040_v43 }
 0x3ec   :  { %v1077_v35 = vpop.permute.xlu1 %1076 }
 0x3ed   :  { %1797 = vmatpush.xpose.msk.msrb.mxu0 %vm879_vm12, %v1077_v35  ;;  %v1858_v41 = vpop.eup %1857 }
 0x3ee   :  { %v913_v29 = vsel %vm879_vm12, %v1858_v41, 0.0 }
 0x3f4   :  { %v1075_v38 = vpop.permute.xlu1 %1074 }
 0x3f5   :  { %1798 = vmatmul.msk.f32.vlgmr.msrb.gmra.mxu0 %vm879_vm12, %v1075_v38 }
 0x412   :  { %914 = vadd.xlane.f32.xlu2 %v913_v29 }
 0x42a   :  { %1227 = vrot.lane.b32.xlu2 %v2207_v55, %s1911_s30 }
 0x444   :  { %v996_v45 = vpop.xlane.xlu2 %995 }
 0x445   :  { %1859 = vrcp.f32 %v996_v45  ;;  %v1008_v50 = vand.u32 2147483648, %v996_v45  ;;  %v1006_v52 = vand.u32 2147483647, %v996_v45  ;;  %vm1002_vm7 = vweird.f32 %v996_v45 }
 0x447   :  { %v1009_v7 = vor.u32 1.1754944e-38, %v1008_v50  ;;  %vm1007_vm9 = vcmp.eq.f32.partialorder %v1006_v52, 8.507059e+37 }
 0x44b   :  { %v1860_v46 = vpop.eup %1859 }
 0x44c   :  { %v998_v47 = vmul.f32 %v1860_v46, %v996_v45  ;;  %v1175_v48 = vpop.permute.xlu2 %1174  ;;  %vm1003_vm6 = vweird.f32 %v1860_v46 }
 0x44d   :  { %1801 = vmatpush.xpose.msk.msra.mxu2 %vm879_vm12, %v1175_v48  ;;  %vm1004_vm8 = vmor %vm1002_vm7, %vm1003_vm6 }
 0x44e   :  { %v999_v23 = vsub.f32 1.0, %v998_v47 }
 0x450   :  { %v1000_v51 = vmul.f32 %v1860_v46, %v999_v23 }
 0x452   :  { %v1001_v53 = vadd.f32 %v1860_v46, %v1000_v51  ;;  %v788_v51 = vmul.f32 %v2280_v22, %v2186_v19 }
 0x454   :  { %v1005_v54 = vsel %vm1004_vm8, %v1860_v46, %v1001_v53  ;;  %v2345_v53 = vpack.c.bf16 %v2186_v19, %v2186_v19 }
 0x455   :  { %v1010_v27 = vsel %vm1007_vm9, %v1009_v7, %v1005_v54 }
 0x456   :  { %v1011_v44 = vmul.f32 %v1856_v32, %v1010_v27 }
 0x458   :  { %v1012_v56 = vpack.c.bf16 %v1011_v44, %v1011_v44 }
 0x45a   :  { %1794 = vmatmul.msk.bf16.vlgmr.msra.gmra.mxu1 %vm879_vm12, %v1012_v56 }
 0x485   :  { %v915_v18 = vpop.xlane.xlu2 %914 }
 0x486   :  { %1861 = vrcp.f32 %v915_v18  ;;  %v927_v60 = vand.u32 2147483648, %v915_v18  ;;  %v925_v15 = vand.u32 2147483647, %v915_v18  ;;  %vm921_vm11 = vweird.f32 %v915_v18 }
 0x488   :  { %v928_v62 = vor.u32 1.1754944e-38, %v927_v60  ;;  %vm926_vm1 = vcmp.eq.f32.partialorder %v925_v15, 8.507059e+37  ;;  %v1151_v60 = vld [vmem:[%s2509_s5 + $0x8] sm:$0xf] }
 0x489   :  { %v1156_v15 = vsel %vm939_vm13, %v1151_v60, 0 }
 0x48a   :  { %1165 = vmatpush.bf16.msrb.mxu1 %v1156_v15 }
 0x48c   :  { %v1862_v59 = vpop.eup %1861 }
 0x48d   :  { %v917_v37 = vmul.f32 %v1862_v59, %v915_v18  ;;  %vm922_vm10 = vweird.f32 %v1862_v59  ;;  %v1228_v2 = vpop.permute.xlu2 %1227 }
 0x48e   :  { %vm923_vm15 = vmor %vm921_vm11, %vm922_vm10  ;;  %v1233_v6 = vsel %vm939_vm13, %v1228_v2, 0 }
 0x48f   :  { %v918_v8 = vsub.f32 1.0, %v917_v37 }
 0x491   :  { %v919_v61 = vmul.f32 %v1862_v59, %v918_v8 }
 0x493   :  { %v920_v24 = vadd.f32 %v1862_v59, %v919_v61 }
 0x495   :  { %v924_v31 = vsel %vm923_vm15, %v1862_v59, %v920_v24 }
 0x496   :  { %v929_v63 = vsel %vm926_vm1, %v928_v62, %v924_v31 }
 0x497   :  { %v930_v12 = vmul.f32 %v1858_v41, %v929_v63 }
 0x499   :  { %v931_v4 = vpack.c.bf16 %v930_v12, %v930_v12 }
 0x49b   :  { %1791 = vmatmul.msk.bf16.vlgmr.msrb.gmra.mxu3 %vm879_vm12, %v931_v4 }
 0x49c   :  { %1242 = vmatpush.bf16.msrb.mxu3 %v1233_v6 }
 0x4d7   :  { %v1030_v16 = vpop.f32.mrf.mxu1 }
 0x4d8   :  { %v1034_v9 = vpack.c.bf16 %v1030_v16, %v1030_v16 }
 0x4da   :  { %1795 = vmatmul.msk.bf16.vlgmr.msrb.gmra.mxu2 %vm879_vm12, %v1034_v9 }
 0x4df   :  { %v1032_v17 = vpop.f32.mrf.mxu1 }
 0x4ea   :  { %1802 = vmatmul.msk.f32.vlgmr.msra.gmra.mxu2 %vm879_vm12, %v2285_v1  ;;  %v777_v1 = vsel %vm775_vm2, %v2262_v10, %v466_v36  ;;  %v827_v10 = vpop.permute.xlu1 %826 }
 0x4eb   :  { %v781_v41 = vsel %vm774_vm4, %v777_v1, %v780_v40  ;;  %v831_v14 = vmul.f32 %v827_v10, %v2186_v19 }
 0x4ec   :  { %v782_v29 = vsel %vm462_vm5, nan, %v781_v41 }
 0x4ed   :  { %v864_v58 = vmul.f32 %v860_v30, %v782_v29  ;;  %v819_v50 = vmul.f32 %v2220_v49, %v782_v29  ;;  %v1099_v49 = vpop.f32.mrf.mxu0  ;;  %v1249_v30 = vld [vmem:[%s2509_s5 + $0xc] sm:$0xf] }
 0x4ee   :  { %v1102_v22 = vmul.f32 0.35355338, %v1099_v49 }
 0x4ef   :  { %v2335_v52 = vadd.f32 %v819_v50, %v788_v51 }
 0x4f0   :  { %v1103_v7 = vsel %vm2224_vm14, %v1102_v22, -3.4028235e+38 }
 0x51e   :  { %v952_v21 = vpop.f32.mrf.mxu3 }
 0x51f   :  { %v956_v25 = vpack.c.bf16 %v952_v21, %v952_v21 }
 0x521   :  { %1796 = vmatmul.msk.bf16.vlgmr.msra.gmra.mxu3 %vm879_vm12, %v956_v25 }
 0x526   :  { %v954_v26 = vpop.f32.mrf.mxu3 }
 0x55d   :  { %v1051_v32 = vpop.f32.mrf.mxu2 }
 0x565   :  { %v1053_v11 = vpop.f32.mrf.mxu2 }
 0x56d   :  { %v1197_v3 = vpop.f32.mrf.mxu2 }
 0x56e   :  { %v1200_v33 = vmul.f32 0.35355338, %v1197_v3 }
 0x570   :  { %v1201_v35 = vsel %vm2224_vm14, %v1200_v33, -3.4028235e+38 }
 0x571   :  { %v1202_v38 = vsel %vm879_vm12, %v1201_v35, -inf }
 0x572   :  { %1203 = vmax.xlane.f32.xlu0 %v1202_v38 }
 0x586   :  { %869 = vrot.lane.b32.xlu0 %v864_v58, %s1902_s21 }
 0x5a4   :  { %v1070_v20 = vpop.f32.mrf.mxu3 }
 0x5a5   :  { %v2324_v43 = vadd.f32 %v1070_v20, %v1051_v32  ;;  %v1254_v32 = vsel %vm939_vm13, %v1249_v30, 0 }
 0x5a6   :  { %1263 = vmatpush.bf16.msrb.mxu2 %v1254_v32 }
 0x5ac   :  { %v1072_v45 = vpop.f32.mrf.mxu3 }
 0x5e5   :  { %v1204_v46 = vpop.xlane.xlu0 %1203 }
 0x5e6   :  { %v1205_v47 = vsub.f32 %v1201_v35, %v1204_v46 }
 0x5e8   :  { %v1206_v48 = vmul.f32 1.442695, %v1205_v47 }
 0x5ea   :  { %1863 = vpow2.f32 %v1206_v48 }
 0x5f0   :  { %v1864_v36 = vpop.eup %1863 }
 0x5f1   :  { %v1208_v23 = vsel %vm879_vm12, %v1864_v36, 0.0 }
 0x5f2   :  { %1209 = vadd.xlane.f32.xlu1 %v1208_v23 }
 0x5f8   :  { %v870_v0 = vpop.permute.xlu0 %869 }
 0x5f9   :  { %v2328_v42 = vadd.f32 %v870_v0, %v831_v14 }
 0x5fb   :  { %1353 = vrot.lane.b32.xlu0 %v2328_v42, %s1904_s23 }
 0x603   :  { %1351 = vrot.lane.b32.xlu0 %v2335_v52, %s1903_s22 }
 0x60b   :  { %1129 = vrot.lane.b32.xlu1 %v2207_v55, %s1912_s13  ;;  %v1104_v55 = vsel %vm879_vm12, %v1103_v7, -inf }
 0x613   :  { %1272 = vrot.lane.b32.xlu1 %v2328_v42, %s1901_s1 }
 0x61b   :  { %1406 = vrot.lane.b32.xlu1 %v2345_v53, %s1905_s24 }
 0x623   :  { %1328 = vrot.lane.b32.xlu1 %v2345_v53, %s1907_s26 }
 0x62b   :  { %1469 = vrot.lane.b32.xlu1 %v2328_v42, %s1908_s27 }
 0x62d   :  { %1105 = vmax.xlane.f32.xlu0 %v1104_v55 }
 0x633   :  { %1467 = vrot.lane.b32.xlu1 %v2335_v52, %s1909_s28 }
 0x665   :  { %v1210_v19 = vpop.xlane.xlu1 %1209 }
 0x666   :  { %1865 = vrcp.f32 %v1210_v19  ;;  %v1222_v57 = vand.u32 2147483648, %v1210_v19  ;;  %v1220_v18 = vand.u32 2147483647, %v1210_v19  ;;  %vm1216_vm6 = vweird.f32 %v1210_v19 }
 0x668   :  { %v1223_v37 = vor.u32 1.1754944e-38, %v1222_v57  ;;  %vm1221_vm8 = vcmp.eq.f32.partialorder %v1220_v18, 8.507059e+37 }
 0x66c   :  { %v1866_v54 = vpop.eup %1865 }
 0x66d   :  { %v1212_v27 = vmul.f32 %v1866_v54, %v1210_v19  ;;  %v1354_v44 = vpop.permute.xlu0 %1353  ;;  %vm1217_vm5 = vweird.f32 %v1866_v54 }
 0x66e   :  { %1808 = vmatpush.xpose.msk.msra.mxu3 %vm879_vm12, %v1354_v44  ;;  %vm1218_vm7 = vmor %vm1216_vm6, %vm1217_vm5 }
 0x66f   :  { %v1213_v56 = vsub.f32 1.0, %v1212_v27 }
 0x671   :  { %v1214_v34 = vmul.f32 %v1866_v54, %v1213_v56 }
 0x673   :  { %v1215_v59 = vadd.f32 %v1866_v54, %v1214_v34 }
 0x675   :  { %v1219_v8 = vsel %vm1218_vm7, %v1866_v54, %v1215_v59  ;;  %v1352_v2 = vpop.permute.xlu0 %1351 }
 0x676   :  { %v1224_v61 = vsel %vm1221_vm8, %v1223_v37, %v1219_v8 }
 0x677   :  { %v1225_v24 = vmul.f32 %v1864_v36, %v1224_v61 }
 0x679   :  { %v1226_v62 = vpack.c.bf16 %v1225_v24, %v1225_v24 }
 0x67b   :  { %1803 = vmatmul.msk.bf16.vlgmr.msrb.gmra.mxu3 %vm879_vm12, %v1226_v62 }
 0x67d   :  { %v1130_v31 = vpop.permute.xlu1 %1129 }
 0x67e   :  { %v1135_v63 = vsel %vm939_vm13, %v1130_v31, 0 }
 0x67f   :  { %1144 = vmatpush.bf16.msra.mxu0 %v1135_v63 }
 0x685   :  { %v1273_v12 = vpop.permute.xlu1 %1272 }
 0x686   :  { %1805 = vmatpush.xpose.msk.msrb.mxu0 %vm879_vm12, %v1273_v12 }
 0x68b   :  { %1809 = vmatmul.msk.f32.vlgmr.msra.gmra.mxu3 %vm879_vm12, %v1352_v2 }
 0x68d   :  { %v1407_v4 = vpop.permute.xlu1 %1406 }
 0x68e   :  { %v1412_v14 = vsel %vm939_vm13, %v1407_v4, 0 }
 0x695   :  { %v1329_v6 = vpop.permute.xlu1 %1328 }
 0x696   :  { %v1334_v16 = vsel %vm939_vm13, %v1329_v6, 0 }
 0x697   :  { %1343 = vmatpush.bf16.msra.mxu1 %v1334_v16 }
 0x69d   :  { %v1470_v27 = vpop.permute.xlu1 %1469 }
 0x6a0   :  { %v1106_v9 = vpop.xlane.xlu0 %1105 }
 0x6a1   :  { %v1107_v17 = vsub.f32 %v1103_v7, %v1106_v9 }
 0x6a3   :  { %v1108_v21 = vmul.f32 1.442695, %v1107_v17 }
 0x6a5   :  { %1867 = vpow2.f32 %v1108_v21 }
 0x6ab   :  { %v1868_v25 = vpop.eup %1867 }
 0x6ac   :  { %v1110_v26 = vsel %vm879_vm12, %v1868_v25, 0.0 }
 0x6ad   :  { %1111 = vadd.xlane.f32.xlu2 %v1110_v26 }
 0x6fe   :  { %v1244_v11 = vpop.f32.mrf.mxu3 }
 0x6ff   :  { %v1248_v3 = vpack.c.bf16 %v1244_v11, %v1244_v11  ;;  %v1891_v11 = vld [vmem:[%s2505_s0] sm:$0xff] }
 0x701   :  { %1804 = vmatmul.msk.bf16.vlgmr.msrb.gmra.mxu2 %vm879_vm12, %v1248_v3 }
 0x706   :  { %v1246_v33 = vpop.f32.mrf.mxu3 }
 0x70e   :  { %v1376_v35 = vpop.f32.mrf.mxu3 }
 0x70f   :  { %v1379_v38 = vmul.f32 0.35355338, %v1376_v35 }
 0x711   :  { %v1380_v39 = vsel %vm2224_vm14, %v1379_v38, -3.4028235e+38 }
 0x712   :  { %v1381_v5 = vsel %vm879_vm12, %v1380_v39, -inf }
 0x713   :  { %1382 = vmax.xlane.f32.xlu2 %v1381_v5 }
 0x720   :  { %v1112_v1 = vpop.xlane.xlu2 %1111 }
 0x721   :  { %1869 = vrcp.f32 %v1112_v1  ;;  %v1124_v58 = vand.u32 2147483648, %v1112_v1  ;;  %v1122_v45 = vand.u32 2147483647, %v1112_v1  ;;  %vm1118_vm10 = vweird.f32 %v1112_v1 }
 0x723   :  { %v1125_v47 = vor.u32 1.1754944e-38, %v1124_v58  ;;  %vm1123_vm15 = vcmp.eq.f32.partialorder %v1122_v45, 8.507059e+37 }
 0x727   :  { %v1870_v40 = vpop.eup %1869 }
 0x728   :  { %v1114_v41 = vmul.f32 %v1870_v40, %v1112_v1  ;;  %vm1119_vm9 = vweird.f32 %v1870_v40 }
 0x729   :  { %vm1120_vm11 = vmor %vm1118_vm10, %vm1119_vm9 }
 0x72a   :  { %v1115_v29 = vsub.f32 1.0, %v1114_v41 }
 0x72c   :  { %v1116_v20 = vmul.f32 %v1870_v40, %v1115_v29 }
 0x72e   :  { %v1117_v46 = vadd.f32 %v1870_v40, %v1116_v20 }
 0x730   :  { %v1121_v48 = vsel %vm1120_vm11, %v1870_v40, %v1117_v46 }
 0x731   :  { %v1126_v36 = vsel %vm1123_vm15, %v1125_v47, %v1121_v48 }
 0x732   :  { %v1127_v23 = vmul.f32 %v1868_v25, %v1126_v36 }
 0x734   :  { %v1128_v10 = vpack.c.bf16 %v1127_v23, %v1127_v23 }
 0x736   :  { %1799 = vmatmul.msk.bf16.vlgmr.msra.gmra.mxu0 %vm879_vm12, %v1128_v10 }
 0x737   :  { %1421 = vmatpush.bf16.msra.mxu0 %v1412_v14  ;;  %v1468_v14 = vpop.permute.xlu1 %1467 }
 0x746   :  { %1806 = vmatmul.msk.f32.vlgmr.msrb.gmra.mxu0 %vm879_vm12, %v2335_v52 }
 0x784   :  { %v1265_v0 = vpop.f32.mrf.mxu2 }
 0x786   :  { %v1383_v50 = vpop.xlane.xlu2 %1382 }
 0x787   :  { %v1384_v51 = vsub.f32 %v1380_v39, %v1383_v50 }
 0x789   :  { %v1385_v49 = vmul.f32 1.442695, %v1384_v51  ;;  %v1350_v51 = vld [vmem:[%s2509_s5] sm:$0xf] }
 0x78b   :  { %1871 = vpow2.f32 %v1385_v49  ;;  %v1452_v49 = vsel %vm939_vm13, %v1350_v51, 0 }
 0x78c   :  { %v1267_v22 = vpop.f32.mrf.mxu2  ;;  %1461 = vmatpush.bf16.msrb.mxu3 %v1452_v49 }
 0x791   :  { %v1872_v7 = vpop.eup %1871 }
 0x792   :  { %v1387_v55 = vsel %vm879_vm12, %v1872_v7, 0.0 }
 0x793   :  { %1388 = vadd.xlane.f32.xlu0 %v1387_v55 }
 0x7b3   :  { %v1146_v19 = vpop.f32.mrf.mxu0 }
 0x7b4   :  { %v1150_v54 = vpack.c.bf16 %v1146_v19, %v1146_v19 }
 0x7b6   :  { %1800 = vmatmul.msk.bf16.vlgmr.msrb.gmra.mxu1 %vm879_vm12, %v1150_v54 }
 0x7b7   :  { %1813 = vmatpush.xpose.msk.msrb.mxu1 %vm879_vm12, %v1470_v27 }
 0x7bb   :  { %v1148_v44 = vpop.f32.mrf.mxu0 }
 0x7c3   :  { %v1296_v56 = vpop.f32.mrf.mxu0 }
 0x7c4   :  { %v1299_v57 = vmul.f32 0.35355338, %v1296_v56 }
 0x7c6   :  { %v1300_v34 = vsel %vm2224_vm14, %v1299_v57, -3.4028235e+38 }
 0x7c7   :  { %v1301_v18 = vsel %vm879_vm12, %v1300_v34, -inf }
 0x7c8   :  { %1302 = vmax.xlane.f32.xlu2 %v1301_v18 }
 0x7e0   :  { %1567 = vrot.lane.b32.xlu2 %v2328_v42, %s1910_s29  ;;  %v1428_v42 = vld [vmem:[%s2509_s5 + $0x4] sm:$0xf] }
 0x7e1   :  { %v1433_v6 = vsel %vm939_vm13, %v1428_v42, 0 }
 0x7e2   :  { %1442 = vmatpush.bf16.msra.mxu2 %v1433_v6 }
 0x806   :  { %v1389_v59 = vpop.xlane.xlu0 %1388 }
 0x807   :  { %1873 = vrcp.f32 %v1389_v59  ;;  %v1401_v61 = vand.u32 2147483648, %v1389_v59  ;;  %v1399_v24 = vand.u32 2147483647, %v1389_v59  ;;  %vm1395_vm2 = vweird.f32 %v1389_v59 }
 0x809   :  { %v1402_v31 = vor.u32 1.1754944e-38, %v1401_v61  ;;  %vm1400_vm4 = vcmp.eq.f32.partialorder %v1399_v24, 8.507059e+37 }
 0x80d   :  { %v1874_v37 = vpop.eup %1873 }
 0x80e   :  { %v1391_v8 = vmul.f32 %v1874_v37, %v1389_v59  ;;  %vm1396_vm1 = vweird.f32 %v1874_v37 }
 0x80f   :  { %vm1397_vm3 = vmor %vm1395_vm2, %vm1396_vm1 }
 0x810   :  { %v1392_v60 = vsub.f32 1.0, %v1391_v8 }
 0x812   :  { %v1393_v15 = vmul.f32 %v1874_v37, %v1392_v60 }
 0x814   :  { %v1394_v62 = vadd.f32 %v1874_v37, %v1393_v15 }
 0x816   :  { %v1398_v63 = vsel %vm1397_vm3, %v1874_v37, %v1394_v62 }
 0x817   :  { %v1403_v12 = vsel %vm1400_vm4, %v1402_v31, %v1398_v63 }
 0x818   :  { %v1404_v2 = vmul.f32 %v1872_v7, %v1403_v12 }
 0x81a   :  { %v1405_v4 = vpack.c.bf16 %v1404_v2, %v1404_v2 }
 0x81c   :  { %1810 = vmatmul.msk.bf16.vlgmr.msra.gmra.mxu0 %vm879_vm12, %v1405_v4 }
 0x833   :  { %v1167_v16 = vpop.f32.mrf.mxu1 }
 0x834   :  { %v1171_v9 = vadd.f32 %v1167_v16, %v2324_v43 }
 0x836   :  { %v1269_v17 = vadd.f32 %v1265_v0, %v1171_v9 }
 0x838   :  { %1270 = vst.msk [vmem:[#allocation2] sm:$0xff] %vm33_vm0, %v1269_v17 }
 0x83b   :  { %v1169_v21 = vpop.f32.mrf.mxu1  ;;  %v1303_v25 = vpop.xlane.xlu2 %1302 }
 0x83c   :  { %v1304_v26 = vsub.f32 %v1300_v34, %v1303_v25  ;;  %v1724_v25 = vld [vmem:[%s2512_s6 + $0x18] sm:$0xff] }
 0x83e   :  { %v1305_v30 = vmul.f32 1.442695, %v1304_v26 }
 0x83f   :  { %v1664_v32 = vld [vmem:[#allocation2] sm:$0xff] }
 0x840   :  { %1875 = vpow2.f32 %v1305_v30  ;;  %v2399_v3 = vadd.f32 %v1891_v11, %v1664_v32  ;;  %v1723_v32 = vld [vmem:[%s2512_s6 + $0x10] sm:$0xff] }
 0x842   :  { %1668 = vst.msk [vmem:[%s2510_s7] sm:$0xff] %vm33_vm0, %v2399_v3  ;;  %v1670_v2 = vmul.f32 %v2399_v3, %v2399_v3 }
 0x843   :  { %v1568_v43 = vpop.permute.xlu2 %1567 }
 0x844   :  { %1817 = vmatpush.xpose.msk.msrb.mxu2 %vm879_vm12, %v1568_v43  ;;  %v1672_v6 = vsel %vm33_vm0, %v1670_v2, 0.0 }
 0x846   :  { %v1876_v33 = vpop.eup %1875 }
 0x847   :  { %v1307_v35 = vsel %vm879_vm12, %v1876_v33, 0.0 }
 0x848   :  { %1308 = vadd.xlane.f32.xlu0 %v1307_v35  ;;  %v1722_v35 = vld [vmem:[%s2512_s6 + $0x8] sm:$0xff] }
 0x85c   :  { %1565 = vrot.lane.b32.xlu0 %v2335_v52, %s1906_s25 }
 0x899   :  { %v1423_v38 = vpop.f32.mrf.mxu0 }
 0x89a   :  { %v1427_v39 = vpack.c.bf16 %v1423_v38, %v1423_v38 }
 0x89c   :  { %1811 = vmatmul.msk.bf16.vlgmr.msra.gmra.mxu2 %vm879_vm12, %v1427_v39 }
 0x8a1   :  { %v1425_v5 = vpop.f32.mrf.mxu0 }
 0x8a2   :  { %v1721_v5 = vld [vmem:[%s2512_s6] sm:$0xff] }
 0x8bb   :  { %v1309_v1 = vpop.xlane.xlu0 %1308 }
 0x8bc   :  { %1877 = vrcp.f32 %v1309_v1  ;;  %v1321_v58 = vand.u32 2147483648, %v1309_v1  ;;  %v1319_v45 = vand.u32 2147483647, %v1309_v1  ;;  %vm1315_vm6 = vweird.f32 %v1309_v1 }
 0x8be   :  { %v1322_v47 = vor.u32 1.1754944e-38, %v1321_v58  ;;  %vm1320_vm8 = vcmp.eq.f32.partialorder %v1319_v45, 8.507059e+37 }
 0x8c2   :  { %v1878_v40 = vpop.eup %1877 }
 0x8c3   :  { %v1311_v41 = vmul.f32 %v1878_v40, %v1309_v1  ;;  %vm1316_vm5 = vweird.f32 %v1878_v40 }
 0x8c4   :  { %vm1317_vm7 = vmor %vm1315_vm6, %vm1316_vm5 }
 0x8c5   :  { %v1312_v29 = vsub.f32 1.0, %v1311_v41 }
 0x8c7   :  { %v1313_v20 = vmul.f32 %v1878_v40, %v1312_v29 }
 0x8c9   :  { %v1314_v46 = vadd.f32 %v1878_v40, %v1313_v20 }
 0x8cb   :  { %v1318_v48 = vsel %vm1317_vm7, %v1878_v40, %v1314_v46  ;;  %vm1718_vm7 = vcmask 523520  }
 0x8cc   :  { %v1323_v52 = vsel %vm1320_vm8, %v1322_v47, %v1318_v48  ;;  %vm1752_vm8 = vcmask 31744  }
 0x8cd   :  { %v1324_v36 = vmul.f32 %v1876_v33, %v1323_v52 }
 0x8ce   :  { %v1566_v23 = vpop.permute.xlu0 %1565 }
 0x8cf   :  { %1818 = vmatmul.msk.f32.vlgmr.msrb.gmra.mxu2 %vm879_vm12, %v1566_v23  ;;  %v1325_v10 = vpack.c.bf16 %v1324_v36, %v1324_v36 }
 0x8d1   :  { %1807 = vmatmul.msk.bf16.vlgmr.msra.gmra.mxu1 %vm879_vm12, %v1325_v10 }
 0x8e1   :  { %1814 = vmatmul.msk.f32.vlgmr.msrb.gmra.mxu1 %vm879_vm12, %v1468_v14 }
 0x91f   :  { %v2414_v0 = vpop.f32.mrf.mxu2 }
 0x927   :  { %v1446_v50 = vpop.f32.mrf.mxu2 }
 0x94e   :  { %v1345_v22 = vpop.f32.mrf.mxu1 }
 0x94f   :  { %v1349_v7 = vpack.c.bf16 %v1345_v22, %v1345_v22 }
 0x951   :  { %1812 = vmatmul.msk.bf16.vlgmr.msrb.gmra.mxu3 %vm879_vm12, %v1349_v7 }
 0x952   :  { %v1590_v55 = vpop.f32.mrf.mxu2 }
 0x953   :  { %v1593_v19 = vmul.f32 0.35355338, %v1590_v55 }
 0x955   :  { %v1594_v54 = vsel %vm2224_vm14, %v1593_v19, -3.4028235e+38 }
 0x956   :  { %v1347_v27 = vpop.f32.mrf.mxu1  ;;  %v1595_v44 = vsel %vm879_vm12, %v1594_v54, -inf }
 0x957   :  { %1596 = vmax.xlane.f32.xlu1 %v1595_v44 }
 0x95e   :  { %v1492_v56 = vpop.f32.mrf.mxu1 }
 0x95f   :  { %v1495_v57 = vmul.f32 0.35355338, %v1492_v56  ;;  %v1846_v56 = vld [vmem:[%s2511_s3] ss:$0 sm:$0xff] }
 0x961   :  { %v1496_v34 = vsel %vm2224_vm14, %v1495_v57, -3.4028235e+38 }
 0x962   :  { %v1497_v18 = vsel %vm879_vm12, %v1496_v34, -inf }
 0x963   :  { %1498 = vmax.xlane.f32.xlu0 %v1497_v18 }
 0x977   :  { %1620 = vrot.lane.b32.xlu0 %v2345_v53, %s1911_s30 }
 0x9ca   :  { %v1597_v59 = vpop.xlane.xlu1 %1596 }
 0x9cb   :  { %v1598_v37 = vsub.f32 %v1594_v54, %v1597_v59  ;;  %v1642_v59 = vld [vmem:[%s2509_s5 + $0xc] sm:$0xf] }
 0x9cd   :  { %v1599_v8 = vmul.f32 1.442695, %v1598_v37  ;;  %v1647_v37 = vsel %vm939_vm13, %v1642_v59, 0 }
 0x9ce   :  { %1656 = vmatpush.bf16.msra.mxu2 %v1647_v37 }
 0x9cf   :  { %1879 = vpow2.f32 %v1599_v8  ;;  %v1544_v8 = vld [vmem:[%s2509_s5 + $0x8] sm:$0xf] }
 0x9d4   :  { %v2429_v60 = vpop.f32.mrf.mxu3 }
 0x9d5   :  { %v1880_v61 = vpop.eup %1879  ;;  %v1464_v2 = vadd.f32 %v2429_v60, %v2414_v0 }
 0x9d6   :  { %v1499_v15 = vpop.xlane.xlu0 %1498  ;;  %v1601_v24 = vsel %vm879_vm12, %v1880_v61, 0.0 }
 0x9d7   :  { %v1500_v62 = vsub.f32 %v1496_v34, %v1499_v15  ;;  %1602 = vadd.xlane.f32.xlu2 %v1601_v24 }
 0x9d9   :  { %v1501_v28 = vmul.f32 1.442695, %v1500_v62 }
 0x9db   :  { %1881 = vpow2.f32 %v1501_v28 }
 0x9dc   :  { %v1465_v31 = vpop.f32.mrf.mxu3 }
 0x9e1   :  { %v2432_v63 = vpop.eup %1881 }
 0x9e2   :  { %v1503_v12 = vsel %vm879_vm12, %v2432_v63, 0.0 }
 0x9e3   :  { %1504 = vadd.xlane.f32.xlu1 %v1503_v12 }
 0x9e9   :  { %v1621_v4 = vpop.permute.xlu0 %1620 }
 0x9ea   :  { %v1626_v42 = vsel %vm939_vm13, %v1621_v4, 0 }
 0x9eb   :  { %1635 = vmatpush.bf16.msra.mxu3 %v1626_v42  ;;  %1673 = vadd.xlane.f32.xlu1 %v1672_v6 }
 0x9ef   :  { %1522 = vrot.lane.b32.xlu2 %v2345_v53, %s1912_s13 }
 0xa4a   :  { %v1603_v16 = vpop.xlane.xlu2 %1602 }
 0xa4b   :  { %1883 = vrcp.f32 %v1603_v16  ;;  %v1615_v11 = vand.u32 2147483648, %v1603_v16  ;;  %v1613_v43 = vand.u32 2147483647, %v1603_v16  ;;  %vm1609_vm9 = vweird.f32 %v1603_v16 }
 0xa4d   :  { %v1616_v39 = vor.u32 1.1754944e-38, %v1615_v11  ;;  %vm1614_vm11 = vcmp.eq.f32.partialorder %v1613_v43, 8.507059e+37 }
 0xa51   :  { %v1884_v9 = vpop.eup %1883 }
 0xa52   :  { %v1605_v17 = vmul.f32 %v1884_v9, %v1603_v16  ;;  %v1523_v21 = vpop.permute.xlu2 %1522  ;;  %vm1610_vm14 = vweird.f32 %v1884_v9 }
 0xa53   :  { %v1528_v26 = vsel %vm939_vm13, %v1523_v21, 0  ;;  %vm1611_vm10 = vmor %vm1609_vm9, %vm1610_vm14 }
 0xa54   :  { %v1606_v30 = vsub.f32 1.0, %v1605_v17  ;;  %1537 = vmatpush.bf16.msrb.mxu0 %v1528_v26 }
 0xa56   :  { %v1607_v53 = vmul.f32 %v1884_v9, %v1606_v30  ;;  %v1505_v33 = vpop.xlane.xlu1 %1504 }
 0xa57   :  { %1885 = vrcp.f32 %v1505_v33  ;;  %v1517_v48 = vand.u32 2147483648, %v1505_v33  ;;  %v1515_v23 = vand.u32 2147483647, %v1505_v33  ;;  %vm1511_vm1 = vweird.f32 %v1505_v33 }
 0xa58   :  { %1741 = vmatpush.msra.mxu0 %v1724_v25  ;;  %v1608_v38 = vadd.f32 %v1884_v9, %v1607_v53  ;;  %v1892_v25 = vld [vmem:[%s2505_s0 + $0x8] sm:$0xff] }
 0xa59   :  { %v1518_v14 = vor.u32 1.1754944e-38, %v1517_v48  ;;  %vm1516_vm3 = vcmp.eq.f32.partialorder %v1515_v23, 8.507059e+37 }
 0xa5a   :  { %1742 = vmatpush.msra.mxu0 %v1723_v32  ;;  %v1612_v1 = vsel %vm1611_vm10, %v1884_v9, %v1608_v38 }
 0xa5b   :  { %v1617_v40 = vsel %vm1614_vm11, %v1616_v39, %v1612_v1 }
 0xa5c   :  { %1743 = vmatpush.msra.mxu0 %v1722_v35  ;;  %v1618_v41 = vmul.f32 %v1880_v61, %v1617_v40  ;;  %v1549_v61 = vsel %vm939_vm13, %v1544_v8, 0 }
 0xa5d   :  { %v1886_v29 = vpop.eup %1885  ;;  %1558 = vmatpush.bf16.msra.mxu1 %v1549_v61 }
 0xa5e   :  { %1744 = vmatpush.msra.mxu0 %v1721_v5  ;;  %v1507_v58 = vmul.f32 %v1886_v29, %v1505_v33  ;;  %v1674_v20 = vpop.xlane.xlu1 %1673  ;;  %v1619_v45 = vpack.c.bf16 %v1618_v41, %v1618_v41  ;;  %vm1512_vm15 = vweird.f32 %v1886_v29 }
 0xa5f   :  { %v1678_v46 = vmul.f32 %v1674_v20, %v1977_v13  ;;  %vm1513_vm2 = vmor %vm1511_vm1, %vm1512_vm15 }
 0xa60   :  { %v1508_v47 = vsub.f32 1.0, %v1507_v58  ;;  %1819 = vmatmul.msk.bf16.vlgmr.msra.gmra.mxu3 %vm879_vm12, %v1619_v45 }
 0xa61   :  { %v1680_v52 = vadd.f32 1e-05, %v1678_v46 }
 0xa62   :  { %v1509_v36 = vmul.f32 %v1886_v29, %v1508_v47 }
 0xa63   :  { %1887 = vrsqrt.f32 %v1680_v52  ;;  %vm1688_vm5 = vweird.f32 %v1680_v52 }
 0xa64   :  { %v1510_v10 = vadd.f32 %v1886_v29, %v1509_v36 }
 0xa66   :  { %v1514_v50 = vsel %vm1513_vm2, %v1886_v29, %v1510_v10 }
 0xa67   :  { %v1519_v51 = vsel %vm1516_vm3, %v1518_v14, %v1514_v50 }
 0xa68   :  { %v1520_v49 = vmul.f32 %v2432_v63, %v1519_v51 }
 0xa69   :  { %v1888_v22 = vpop.eup %1887 }
 0xa6a   :  { %v1683_v7 = vmul.f32 %v1888_v22, %v1680_v52  ;;  %v1521_v55 = vpack.c.bf16 %v1520_v49, %v1520_v49  ;;  %vm1689_vm4 = vweird.f32 %v1888_v22 }
 0xa6b   :  { %vm1690_vm6 = vmor %vm1688_vm5, %vm1689_vm4 }
 0xa6c   :  { %v1684_v19 = vmul.f32 %v1888_v22, %v1683_v7  ;;  %1815 = vmatmul.msk.bf16.vlgmr.msrb.gmra.mxu0 %vm879_vm12, %v1521_v55 }
 0xa6e   :  { %v1685_v54 = vmul.f32 0.5, %v1684_v19 }
 0xa70   :  { %v1686_v27 = vsub.f32 1.5, %v1685_v54 }
 0xa72   :  { %v1687_v44 = vmul.f32 %v1888_v22, %v1686_v27 }
 0xa74   :  { %v1691_v57 = vsel %vm1690_vm6, %v1888_v22, %v1687_v44 }
 0xa75   :  { %v1702_v34 = vmul.f32 %v1691_v57, %v2399_v3 }
 0xa77   :  { %v1708_v18 = vmul.f32 %v1846_v56, %v1702_v34 }
 0xa79   :  { %1712 = vrot.lane.b32.xlu0 %v1708_v18, %s1902_s21 }
 0xa7c   :  { %1821 = vmatmul.msk.f32.vlgmr.msra.gmra.mxu0 %vm33_vm0, %v1708_v18 }
 0xae3   :  { %v1637_v3 = vpop.f32.mrf.mxu3 }
 0xae4   :  { %v1641_v15 = vpack.c.bf16 %v1637_v3, %v1637_v3 }
 0xae6   :  { %1820 = vmatmul.msk.bf16.vlgmr.msra.gmra.mxu2 %vm879_vm12, %v1641_v15 }
 0xae9   :  { %v1539_v24 = vpop.f32.mrf.mxu0 }
 0xaea   :  { %v1543_v62 = vpack.c.bf16 %v1539_v24, %v1539_v24 }
 0xaeb   :  { %v1639_v28 = vpop.f32.mrf.mxu3  ;;  %v1713_v31 = vpop.permute.xlu0 %1712 }
 0xaec   :  { %1719 = vst.msk [vmem:[%s2510_s7] sm:$0xff] %vm1718_vm7, %v1713_v31  ;;  %1816 = vmatmul.msk.bf16.vlgmr.msra.gmra.mxu1 %vm879_vm12, %v1543_v62 }
 0xaf1   :  { %v1541_v63 = vpop.f32.mrf.mxu0 }
 0xaf9   :  { %v1746_v12 = vpop.f32.mrf.mxu0 }
 0xafa   :  { %1753 = vst.msk [vmem:[%s2513_s8] sm:$0xff] %vm1752_vm8, %v1746_v12 }
 0xb69   :  { %v1560_v4 = vpop.f32.mrf.mxu1  ;;  %v1658_v42 = vpop.f32.mrf.mxu2 }
 0xb6a   :  { %v1564_v6 = vadd.f32 %v1560_v4, %v1464_v2 }
 0xb6c   :  { %v1662_v16 = vadd.f32 %v1658_v42, %v1564_v6 }
 0xb6e   :  { %1663 = vst.msk [vmem:[#allocation2 + $0x8] sm:$0xff] %vm33_vm0, %v1662_v16 }
 0xb71   :  { %v1562_v9 = vpop.f32.mrf.mxu1  ;;  %v1660_v17 = vpop.f32.mrf.mxu2 }
 0xb75   :  { %v1665_v21 = vld [vmem:[#allocation2 + $0x8] sm:$0xff] }
 0xb76   :  { %v1667_v26 = vadd.f32 %v1892_v25, %v1665_v21 }
 0xb78   :  { %v1671_v30 = vmul.f32 %v1667_v26, %v1667_v26  ;;  %1669 = vst.msk [vmem:[%s2510_s7 + $0x8] sm:$0xff] %vm33_vm0, %v1667_v26 }
 0xb7a   :  { %v1675_v0 = vsel %vm33_vm0, %v1671_v30, 0.0 }
 0xb7b   :  { %1676 = vadd.xlane.f32.xlu1 %v1675_v0 }
 0xbee   :  { %v1677_v60 = vpop.xlane.xlu1 %1676 }
 0xbef   :  { %v1679_v32 = vmul.f32 %v1677_v60, %v1977_v13 }
 0xbf1   :  { %v1681_v11 = vadd.f32 1e-05, %v1679_v32 }
 0xbf3   :  { %1889 = vrsqrt.f32 %v1681_v11  ;;  %vm1698_vm13 = vweird.f32 %v1681_v11 }
 0xbf9   :  { %v1890_v53 = vpop.eup %1889 }
 0xbfa   :  { %v1693_v43 = vmul.f32 %v1890_v53, %v1681_v11  ;;  %vm1699_vm12 = vweird.f32 %v1890_v53 }
 0xbfb   :  { %vm1700_vm14 = vmor %vm1698_vm13, %vm1699_vm12 }
 0xbfc   :  { %v1694_v33 = vmul.f32 %v1890_v53, %v1693_v43 }
 0xbfe   :  { %v1695_v35 = vmul.f32 0.5, %v1694_v33 }
 0xc00   :  { %v1696_v38 = vsub.f32 1.5, %v1695_v35 }
 0xc02   :  { %v1697_v39 = vmul.f32 %v1890_v53, %v1696_v38 }
 0xc04   :  { %v1701_v5 = vsel %vm1700_vm14, %v1890_v53, %v1697_v39 }
 0xc05   :  { %v1703_v1 = vmul.f32 %v1701_v5, %v1667_v26 }
 0xc07   :  { %v1709_v40 = vmul.f32 %v1846_v56, %v1703_v1 }
 0xc09   :  { %1714 = vrot.lane.b32.xlu1 %v1709_v40, %s1902_s21  ;;  %1822 = vmatmul.msk.f32.gmra.mxu0 %vm33_vm0, %v1709_v40 }
 0xc7b   :  { %v1715_v41 = vpop.permute.xlu1 %1714 }
 0xc7c   :  { %1720 = vst.msk [vmem:[%s2510_s7 + $0x8] sm:$0xff] %vm1718_vm7, %v1715_v41 }
 0xc86   :  { %v1749_v13 = vpop.f32.mrf.mxu0 }
 0xc87   :  { %1754 = vst.msk [vmem:[%s2513_s8 + $0x8] sm:$0xff] %vm1752_vm8, %v1749_v13 }

</bundles_post_ra>
